<compile_context>
chip_gen: v5e
topology: v5e:2x2
jax: 0.10.0
libtpu: 0.0.40
codegen_flags: <defaults>
</compile_context>

<pallas_src>
import math
import functools

import jax
import jax.numpy as jnp
import numpy as np
from jax.experimental import pallas as pl
from jax.experimental.pallas import tpu as pltpu


# ----------------------------------------------------------------------------
# Pallas kernel: one block of BW windows per grid step
# ----------------------------------------------------------------------------
def mha_kernel(x_ref, wqkv_ref, bqkv_ref, wproj_ref, bproj_ref,
               scale_ref, bias_ref, o_ref, *, num_heads, mxu_dtype):
    """Fused QKV proj + cosine attention + softmax + attn@V + output proj.

    x_ref      : (BW, L, C)    input windows (already cast to mxu_dtype)
    wqkv_ref   : (C, 3C)       pre-transposed fused QKV weight (mxu_dtype)
    bqkv_ref   : (1, 3C)       QKV bias (f32)
    wproj_ref  : (C, C)        pre-transposed output-projection weight (mxu_dtype)
    bproj_ref  : (1, C)        projection bias (f32)
    scale_ref  : (H, 1, L, L)  exp(clamped logit_scale) broadcast to (L, L)
    bias_ref   : (H, 1, L, L)  relative positional bias table
    o_ref      : (BW, L, C)    output windows
    """
    BW, L, C = x_ref.shape
    H = num_heads
    d = C // H
    f32 = jnp.float32

    # ---- fused QKV projection: one (BW*L, C) x (C, 3C) GEMM on the MXU -------
    x2 = x_ref[...].reshape(BW * L, C)                       # free leading merge
    qkv = jnp.dot(x2, wqkv_ref[...], preferred_element_type=f32)
    qkv = qkv + bqkv_ref[...]                                # (BW*L, 3C), f32

    # ---- regroup (head, window) into one flat leading batch of size H*BW -----
    # Lane-slice each head's d columns and stack along the (cheap) leading axis;
    # avoids lane-splitting reshapes / 4-D transposes inside VMEM.
    def gather_heads(col0):
        parts = [qkv[:, col0 + h * d: col0 + (h + 1) * d].reshape(BW, L, d)
                 for h in range(H)]
        return jnp.concatenate(parts, axis=0)                # (H*BW, L, d)

    q = gather_heads(0)
    k = gather_heads(C)
    v = gather_heads(2 * C)

    # ---- cosine attention: F.normalize(., dim=-1, eps=1e-12), f32, EUP rsqrt --
    eps2 = 1e-24                                             # eps**2
    q = q * jax.lax.rsqrt(jnp.maximum(jnp.sum(q * q, axis=-1, keepdims=True), eps2))
    k = k * jax.lax.rsqrt(jnp.maximum(jnp.sum(k * k, axis=-1, keepdims=True), eps2))

    # ---- scores: single dot_general batched over the (head, window) axis ------
    attn = jnp.einsum('bqd,bkd->bqk', q.astype(mxu_dtype), k.astype(mxu_dtype),
                      preferred_element_type=f32)            # (H*BW, L, L)
    attn = attn.reshape(H, BW, L, L)
    attn = attn * scale_ref[...] + bias_ref[...]             # per-head scale + bias

    # ---- softmax in f32; denominator reciprocal on the (otherwise idle) EUP ---
    attn = attn - jnp.max(attn, axis=-1, keepdims=True)
    e = jnp.exp(attn)
    p = e * pl.reciprocal(jnp.sum(e, axis=-1, keepdims=True), approx=True)
    p = p.reshape(H * BW, L, L)                              # free leading merge

    # ---- attn @ V, batched over (head, window) --------------------------------
    o = jnp.einsum('bqk,bkd->bqd', p.astype(mxu_dtype), v.astype(mxu_dtype),
                   preferred_element_type=f32)               # (H*BW, L, d)

    # ---- reassemble heads onto the channel (lane) axis: (BW*L, C) -------------
    o2 = jnp.concatenate(
        [o[h * BW:(h + 1) * BW].reshape(BW * L, d) for h in range(H)], axis=-1)

    # ---- output projection: one (BW*L, C) x (C, C) GEMM -----------------------
    y = jnp.dot(o2.astype(mxu_dtype), wproj_ref[...], preferred_element_type=f32)
    y = y + bproj_ref[...]
    # TODO(synk): if the masked (C=32 < 128 lanes) output store ever dominates,
    # present x/out to the kernel flattened as (B, L*C) for a lane-dense store.
    o_ref[...] = y.reshape(BW, L, C).astype(o_ref.dtype)


# ----------------------------------------------------------------------------
# Wrapper
# ----------------------------------------------------------------------------
def _largest_divisor_leq(n, cap):
    cap = max(1, min(n, cap))
    for w in range(cap, 0, -1):
        if n % w == 0:
            return w
    return 1


def multi_head_attention(x, wqkv, bqkv, wproj, bproj, logit_scale, rel_bias,
                         num_heads, *, block_windows=256,
                         mxu_dtype=jnp.float32):
    """Pallas forward.  block_windows = windows fused per grid step."""
    B, L, C = x.shape
    H = num_heads
    out_dtype = x.dtype

    # Batch many windows per grid step to amortize per-step pipeline overhead
    # and turn the projections into real GEMMs.
    bw = _largest_divisor_leq(B, block_windows)
    grid = (B // bw,)

    # torch.clamp(logit_scale, max=log(1/0.01)).exp(), pre-broadcast to an
    # (H, 1, L, L) table so the kernel applies it with a plain broadcast-multiply.
    scale = jnp.exp(jnp.minimum(logit_scale.astype(jnp.float32),
                                math.log(1.0 / 0.01)))
    scale_tab = jnp.broadcast_to(scale.reshape(H, 1, 1, 1), (H, 1, L, L))
    bias_tab = rel_bias.astype(jnp.float32).reshape(H, 1, L, L)

    # Pre-transpose (and pre-cast) grid-invariant weights once, outside the
    # kernel, so no per-step .T / convert is needed.
    x_in = x.astype(mxu_dtype)
    wqkv_t = wqkv.T.astype(mxu_dtype)            # (C, 3C)
    wproj_t = wproj.T.astype(mxu_dtype)          # (C, C)
    bqkv2 = bqkv.reshape(1, 3 * C).astype(jnp.float32)
    bproj2 = bproj.reshape(1, C).astype(jnp.float32)

    kernel = functools.partial(mha_kernel, num_heads=H, mxu_dtype=mxu_dtype)
    return pl.pallas_call(
        kernel,
        out_shape=jax.ShapeDtypeStruct((B, L, C), out_dtype),
        grid=grid,
        in_specs=[
            pl.BlockSpec((bw, L, C), lambda i: (i, 0, 0)),        # x
            pl.BlockSpec((C, 3 * C), lambda i: (0, 0)),           # W_qkv^T
            pl.BlockSpec((1, 3 * C), lambda i: (0, 0)),           # b_qkv
            pl.BlockSpec((C, C), lambda i: (0, 0)),               # W_proj^T
            pl.BlockSpec((1, C), lambda i: (0, 0)),               # b_proj
            pl.BlockSpec((H, 1, L, L), lambda i: (0, 0, 0, 0)),   # logit scale tab
            pl.BlockSpec((H, 1, L, L), lambda i: (0, 0, 0, 0)),   # rel. pos bias
        ],
        out_specs=pl.BlockSpec((bw, L, C), lambda i: (i, 0, 0)),
        compiler_params=pltpu.CompilerParams(
            dimension_semantics=("parallel",)),                   # megacore on v7x
    )(x_in, wqkv_t, bqkv2, wproj_t, bproj2, scale_tab, bias_tab)


# ----------------------------------------------------------------------------
# Parameter setup / relative positional bias (plain JAX glue)
# ----------------------------------------------------------------------------
def make_relative_position_bias(window_size, num_heads, w_m1, b_m1, w_m2, b_m2):
    coords = jnp.stack(
        jnp.meshgrid(jnp.arange(1), jnp.arange(window_size), indexing="ij"),
        axis=0).reshape(2, -1)
    rel = coords[:, :, None] - coords[:, None, :]          # (2, W, W)
    rel = rel.transpose(1, 2, 0).reshape(-1, 2).astype(jnp.float32)
    rel_log = jnp.sign(rel) * jnp.log1p(jnp.abs(rel))      # (W*W, 2)
    # Mlp(2 -> hidden -> num_heads) with ReLU; dropouts are identity at eval
    h1 = jnp.maximum(rel_log @ w_m1.T + b_m1, 0.0)
    bias = h1 @ w_m2.T + b_m2                              # (W*W, H)
    return bias.T.reshape(num_heads, window_size, window_size)   # (H, W, W)


def ref_forward(x, wqkv, bqkv, wproj, bproj, logit_scale, rel_bias, num_heads):
    """Pure-JAX reference mirroring the PyTorch forward."""
    B, L, C = x.shape
    H = num_heads
    d = C // H
    qkv = x @ wqkv.T + bqkv                                 # (B, L, 3C)
    qkv = qkv.reshape(B, L, 3, H, d).transpose(2, 0, 3, 1, 4)
    q, k, v = qkv[0], qkv[1], qkv[2]                        # (B, H, L, d)
    qn = q / jnp.maximum(jnp.linalg.norm(q, axis=-1, keepdims=True), 1e-12)
    kn = k / jnp.maximum(jnp.linalg.norm(k, axis=-1, keepdims=True), 1e-12)
    attn = jnp.einsum("bhld,bhmd->bhlm", qn, kn)
    scale = jnp.exp(jnp.minimum(logit_scale, math.log(1.0 / 0.01)))
    attn = attn * scale[None, :, None, None] + rel_bias[None]
    attn = jax.nn.softmax(attn, axis=-1)
    out = jnp.einsum("bhlm,bhmd->bhld", attn, v)
    out = out.transpose(0, 2, 1, 3).reshape(B, L, C)
    return out @ wproj.T + bproj


# ----------------------------------------------------------------------------
# Main
# ----------------------------------------------------------------------------
if __name__ == "__main__":
    # Small shapes consistent with the module:
    #   dim=32, num_heads=4, window_size=8  ->  x: (B*nW, window_size, dim)
    B, window_size, dim, num_heads = 8, 8, 32, 4
    meta_hidden = 64
    L, C, H = window_size, dim, num_heads

    key = jax.random.PRNGKey(0)
    ks = jax.random.split(key, 10)
    f32 = jnp.float32

    x = jax.random.normal(ks[0], (B, L, C), dtype=f32)

    wqkv = 0.02 * jax.random.normal(ks[1], (3 * C, C), dtype=f32)
    bqkv = 0.01 * jax.random.normal(ks[2], (3 * C,), dtype=f32)
    wproj = 0.02 * jax.random.normal(ks[3], (C, C), dtype=f32)
    bproj = 0.01 * jax.random.normal(ks[4], (C,), dtype=f32)
    logit_scale = jnp.log(10.0 * jnp.ones((H,), dtype=f32))

    # meta MLP (Mlp(2, hidden_features=meta_hidden, out_features=num_heads))
    w_m1 = 0.1 * jax.random.normal(ks[5], (meta_hidden, 2), dtype=f32)
    b_m1 = 0.01 * jax.random.normal(ks[6], (meta_hidden,), dtype=f32)
    w_m2 = 0.1 * jax.random.normal(ks[7], (H, meta_hidden), dtype=f32)
    b_m2 = 0.01 * jax.random.normal(ks[8], (H,), dtype=f32)

    rel_bias = make_relative_position_bias(window_size, H, w_m1, b_m1,
                                           w_m2, b_m2)      # (H, L, L)

    ref = ref_forward(x, wqkv, bqkv, wproj, bproj, logit_scale, rel_bias,
                      num_heads)

    # f32 MXU path; block of 4 windows -> grid=(2,) exercises window batching
    out = multi_head_attention(x, wqkv, bqkv, wproj, bproj, logit_scale,
                               rel_bias, num_heads, block_windows=4)
    out = jax.block_until_ready(out)
    # tolerance allows for the approximate EUP reciprocal in the softmax denom
    np.testing.assert_allclose(np.asarray(out), np.asarray(ref),
                               rtol=1e-2, atol=1e-4)

    # bf16 MXU-operand path (f32 accumulation; normalize/softmax stay in f32)
    out_bf16 = multi_head_attention(x, wqkv, bqkv, wproj, bproj, logit_scale,
                                    rel_bias, num_heads, block_windows=4,
                                    mxu_dtype=jnp.bfloat16)
    out_bf16 = jax.block_until_ready(out_bf16)
    np.testing.assert_allclose(np.asarray(out_bf16), np.asarray(ref),
                               rtol=5e-2, atol=5e-3)

    print("KERNEL_OK")
</pallas_src>

<mosaic_0001>
module attributes {stable_mosaic.version = 11 : i64} {
  func.func @mha_kernel(%arg0: i32, %arg1: memref<4x8x32xf32, #tpu.memory_space<vmem>>, %arg2: memref<32x96xf32, #tpu.memory_space<vmem>>, %arg3: memref<1x96xf32, #tpu.memory_space<vmem>>, %arg4: memref<32x32xf32, #tpu.memory_space<vmem>>, %arg5: memref<1x32xf32, #tpu.memory_space<vmem>>, %arg6: memref<4x1x8x8xf32, #tpu.memory_space<vmem>>, %arg7: memref<4x1x8x8xf32, #tpu.memory_space<vmem>>, %arg8: memref<4x8x32xf32, #tpu.memory_space<vmem>>) attributes {dimension_semantics = [#tpu.dimension_semantics<parallel>], iteration_bounds = array<i64: 2>, scalar_prefetch = 0 : i64, scratch_operands = 0 : i64, tpu.core_type = #tpu.core_type<tc>, window_params = [{transform_indices = @transform_0, window_bounds = array<i64: 4, 8, 32>}, {pipeline_mode = #tpu.pipeline_mode<synchronous>, transform_indices = @transform_1, window_bounds = array<i64: 32, 96>}, {pipeline_mode = #tpu.pipeline_mode<synchronous>, transform_indices = @transform_2, window_bounds = array<i64: 1, 96>}, {pipeline_mode = #tpu.pipeline_mode<synchronous>, transform_indices = @transform_3, window_bounds = array<i64: 32, 32>}, {pipeline_mode = #tpu.pipeline_mode<synchronous>, transform_indices = @transform_4, window_bounds = array<i64: 1, 32>}, {pipeline_mode = #tpu.pipeline_mode<synchronous>, transform_indices = @transform_5, window_bounds = array<i64: 4, 1, 8, 8>}, {pipeline_mode = #tpu.pipeline_mode<synchronous>, transform_indices = @transform_6, window_bounds = array<i64: 4, 1, 8, 8>}, {transform_indices = @transform_7, window_bounds = array<i64: 4, 8, 32>}]} {
    %c0 = arith.constant 0 : index
    %c0_0 = arith.constant 0 : index
    %c0_1 = arith.constant 0 : index
    %0 = vector.load %arg1[%c0, %c0_0, %c0_1] : memref<4x8x32xf32, #tpu.memory_space<vmem>>, vector<4x8x32xf32>
    %1 = vector.shape_cast %0 : vector<4x8x32xf32> to vector<32x32xf32>
    %c0_2 = arith.constant 0 : index
    %c0_3 = arith.constant 0 : index
    %2 = vector.load %arg2[%c0_2, %c0_3] : memref<32x96xf32, #tpu.memory_space<vmem>>, vector<32x96xf32>
    %cst = arith.constant dense<0.000000e+00> : vector<32x96xf32>
    %3 = tpu.matmul %1, %2, %cst {dimension_numbers = #tpu.dot_dimension_numbers<[1], [0], [0], [1], [0, 0, 1, 1], [], []>} : vector<32x32xf32>, vector<32x96xf32>, vector<32x96xf32> -> vector<32x96xf32>
    %c0_4 = arith.constant 0 : index
    %c0_5 = arith.constant 0 : index
    %4 = vector.load %arg3[%c0_4, %c0_5] : memref<1x96xf32, #tpu.memory_space<vmem>>, vector<1x96xf32>
    %5 = vector.broadcast %4 : vector<1x96xf32> to vector<32x96xf32>
    %6 = arith.addf %3, %5 : vector<32x96xf32>
    %7 = vector.extract_strided_slice %6 {offsets = [0, 0], sizes = [32, 8], strides = [1, 1]} : vector<32x96xf32> to vector<32x8xf32>
    %8 = vector.shape_cast %7 : vector<32x8xf32> to vector<4x8x8xf32>
    %9 = vector.extract_strided_slice %6 {offsets = [0, 8], sizes = [32, 8], strides = [1, 1]} : vector<32x96xf32> to vector<32x8xf32>
    %10 = vector.shape_cast %9 : vector<32x8xf32> to vector<4x8x8xf32>
    %11 = vector.extract_strided_slice %6 {offsets = [0, 16], sizes = [32, 8], strides = [1, 1]} : vector<32x96xf32> to vector<32x8xf32>
    %12 = vector.shape_cast %11 : vector<32x8xf32> to vector<4x8x8xf32>
    %13 = vector.extract_strided_slice %6 {offsets = [0, 24], sizes = [32, 8], strides = [1, 1]} : vector<32x96xf32> to vector<32x8xf32>
    %14 = vector.shape_cast %13 : vector<32x8xf32> to vector<4x8x8xf32>
    %15 = tpu.concatenate %8, %10, %12, %14 in 0 : vector<4x8x8xf32>, vector<4x8x8xf32>, vector<4x8x8xf32>, vector<4x8x8xf32> -> vector<16x8x8xf32>
    %16 = vector.extract_strided_slice %6 {offsets = [0, 32], sizes = [32, 8], strides = [1, 1]} : vector<32x96xf32> to vector<32x8xf32>
    %17 = vector.shape_cast %16 : vector<32x8xf32> to vector<4x8x8xf32>
    %18 = vector.extract_strided_slice %6 {offsets = [0, 40], sizes = [32, 8], strides = [1, 1]} : vector<32x96xf32> to vector<32x8xf32>
    %19 = vector.shape_cast %18 : vector<32x8xf32> to vector<4x8x8xf32>
    %20 = vector.extract_strided_slice %6 {offsets = [0, 48], sizes = [32, 8], strides = [1, 1]} : vector<32x96xf32> to vector<32x8xf32>
    %21 = vector.shape_cast %20 : vector<32x8xf32> to vector<4x8x8xf32>
    %22 = vector.extract_strided_slice %6 {offsets = [0, 56], sizes = [32, 8], strides = [1, 1]} : vector<32x96xf32> to vector<32x8xf32>
    %23 = vector.shape_cast %22 : vector<32x8xf32> to vector<4x8x8xf32>
    %24 = tpu.concatenate %17, %19, %21, %23 in 0 : vector<4x8x8xf32>, vector<4x8x8xf32>, vector<4x8x8xf32>, vector<4x8x8xf32> -> vector<16x8x8xf32>
    %25 = vector.extract_strided_slice %6 {offsets = [0, 64], sizes = [32, 8], strides = [1, 1]} : vector<32x96xf32> to vector<32x8xf32>
    %26 = vector.shape_cast %25 : vector<32x8xf32> to vector<4x8x8xf32>
    %27 = vector.extract_strided_slice %6 {offsets = [0, 72], sizes = [32, 8], strides = [1, 1]} : vector<32x96xf32> to vector<32x8xf32>
    %28 = vector.shape_cast %27 : vector<32x8xf32> to vector<4x8x8xf32>
    %29 = vector.extract_strided_slice %6 {offsets = [0, 80], sizes = [32, 8], strides = [1, 1]} : vector<32x96xf32> to vector<32x8xf32>
    %30 = vector.shape_cast %29 : vector<32x8xf32> to vector<4x8x8xf32>
    %31 = vector.extract_strided_slice %6 {offsets = [0, 88], sizes = [32, 8], strides = [1, 1]} : vector<32x96xf32> to vector<32x8xf32>
    %32 = vector.shape_cast %31 : vector<32x8xf32> to vector<4x8x8xf32>
    %33 = tpu.concatenate %26, %28, %30, %32 in 0 : vector<4x8x8xf32>, vector<4x8x8xf32>, vector<4x8x8xf32>, vector<4x8x8xf32> -> vector<16x8x8xf32>
    %34 = arith.mulf %15, %15 : vector<16x8x8xf32>
    %cst_6 = arith.constant dense<0.000000e+00> : vector<16x8xf32>
    %35 = vector.multi_reduction <add>, %34, %cst_6 [2] : vector<16x8x8xf32> to vector<16x8xf32>
    %36 = vector.shape_cast %35 : vector<16x8xf32> to vector<16x8x1xf32>
    %cst_7 = arith.constant 1.000000e-24 : f32
    %37 = vector.broadcast %cst_7 : f32 to vector<16x8x1xf32>
    %38 = arith.maximumf %36, %37 : vector<16x8x1xf32>
    %39 = math.rsqrt %38 : vector<16x8x1xf32>
    %40 = vector.broadcast %39 : vector<16x8x1xf32> to vector<16x8x8xf32>
    %41 = arith.mulf %15, %40 : vector<16x8x8xf32>
    %42 = arith.mulf %24, %24 : vector<16x8x8xf32>
    %cst_8 = arith.constant dense<0.000000e+00> : vector<16x8xf32>
    %43 = vector.multi_reduction <add>, %42, %cst_8 [2] : vector<16x8x8xf32> to vector<16x8xf32>
    %44 = vector.shape_cast %43 : vector<16x8xf32> to vector<16x8x1xf32>
    %cst_9 = arith.constant 1.000000e-24 : f32
    %45 = vector.broadcast %cst_9 : f32 to vector<16x8x1xf32>
    %46 = arith.maximumf %44, %45 : vector<16x8x1xf32>
    %47 = math.rsqrt %46 : vector<16x8x1xf32>
    %48 = vector.broadcast %47 : vector<16x8x1xf32> to vector<16x8x8xf32>
    %49 = arith.mulf %24, %48 : vector<16x8x8xf32>
    "tpu.trace_start"() <{level = 10 : i32, message = "bqd,bkd->bqk"}> : () -> ()
    %cst_10 = arith.constant dense<0.000000e+00> : vector<16x8x8xf32>
    %50 = tpu.matmul %41, %49, %cst_10 {dimension_numbers = #tpu.dot_dimension_numbers<[2], [2], [1], [1], [0, 0, 0, 1, 1, 1], [0], [0]>} : vector<16x8x8xf32>, vector<16x8x8xf32>, vector<16x8x8xf32> -> vector<16x8x8xf32>
    "tpu.trace_stop"() : () -> ()
    %51 = vector.shape_cast %50 : vector<16x8x8xf32> to vector<4x4x8x8xf32>
    %c0_11 = arith.constant 0 : index
    %c0_12 = arith.constant 0 : index
    %c0_13 = arith.constant 0 : index
    %c0_14 = arith.constant 0 : index
    %52 = vector.load %arg6[%c0_11, %c0_12, %c0_13, %c0_14] : memref<4x1x8x8xf32, #tpu.memory_space<vmem>>, vector<4x1x8x8xf32>
    %53 = vector.broadcast %52 : vector<4x1x8x8xf32> to vector<4x4x8x8xf32>
    %54 = arith.mulf %51, %53 : vector<4x4x8x8xf32>
    %c0_15 = arith.constant 0 : index
    %c0_16 = arith.constant 0 : index
    %c0_17 = arith.constant 0 : index
    %c0_18 = arith.constant 0 : index
    %55 = vector.load %arg7[%c0_15, %c0_16, %c0_17, %c0_18] : memref<4x1x8x8xf32, #tpu.memory_space<vmem>>, vector<4x1x8x8xf32>
    %56 = vector.broadcast %55 : vector<4x1x8x8xf32> to vector<4x4x8x8xf32>
    %57 = arith.addf %54, %56 : vector<4x4x8x8xf32>
    %cst_19 = arith.constant dense<0xFF800000> : vector<4x4x8xf32>
    %58 = vector.multi_reduction <maximumf>, %57, %cst_19 [3] : vector<4x4x8x8xf32> to vector<4x4x8xf32>
    %59 = vector.shape_cast %58 : vector<4x4x8xf32> to vector<4x4x8x1xf32>
    %60 = vector.broadcast %59 : vector<4x4x8x1xf32> to vector<4x4x8x8xf32>
    %61 = arith.subf %57, %60 : vector<4x4x8x8xf32>
    %62 = math.exp %61 : vector<4x4x8x8xf32>
    %cst_20 = arith.constant dense<0.000000e+00> : vector<4x4x8xf32>
    %63 = vector.multi_reduction <add>, %62, %cst_20 [3] : vector<4x4x8x8xf32> to vector<4x4x8xf32>
    %64 = vector.shape_cast %63 : vector<4x4x8xf32> to vector<4x4x8x1xf32>
    %65 = tpu.reciprocal %64 {approx = true} : vector<4x4x8x1xf32> -> vector<4x4x8x1xf32>
    %66 = vector.broadcast %65 : vector<4x4x8x1xf32> to vector<4x4x8x8xf32>
    %67 = arith.mulf %62, %66 : vector<4x4x8x8xf32>
    %68 = vector.shape_cast %67 : vector<4x4x8x8xf32> to vector<16x8x8xf32>
    "tpu.trace_start"() <{level = 10 : i32, message = "bqk,bkd->bqd"}> : () -> ()
    %cst_21 = arith.constant dense<0.000000e+00> : vector<16x8x8xf32>
    %69 = tpu.matmul %68, %33, %cst_21 {dimension_numbers = #tpu.dot_dimension_numbers<[2], [1], [1], [2], [0, 0, 0, 1, 1, 2], [0], [0]>} : vector<16x8x8xf32>, vector<16x8x8xf32>, vector<16x8x8xf32> -> vector<16x8x8xf32>
    "tpu.trace_stop"() : () -> ()
    %70 = vector.extract_strided_slice %69 {offsets = [0, 0, 0], sizes = [4, 8, 8], strides = [1, 1, 1]} : vector<16x8x8xf32> to vector<4x8x8xf32>
    %71 = vector.shape_cast %70 : vector<4x8x8xf32> to vector<32x8xf32>
    %72 = vector.extract_strided_slice %69 {offsets = [4, 0, 0], sizes = [4, 8, 8], strides = [1, 1, 1]} : vector<16x8x8xf32> to vector<4x8x8xf32>
    %73 = vector.shape_cast %72 : vector<4x8x8xf32> to vector<32x8xf32>
    %74 = vector.extract_strided_slice %69 {offsets = [8, 0, 0], sizes = [4, 8, 8], strides = [1, 1, 1]} : vector<16x8x8xf32> to vector<4x8x8xf32>
    %75 = vector.shape_cast %74 : vector<4x8x8xf32> to vector<32x8xf32>
    %76 = vector.extract_strided_slice %69 {offsets = [12, 0, 0], sizes = [4, 8, 8], strides = [1, 1, 1]} : vector<16x8x8xf32> to vector<4x8x8xf32>
    %77 = vector.shape_cast %76 : vector<4x8x8xf32> to vector<32x8xf32>
    %78 = tpu.concatenate %71, %73, %75, %77 in 1 : vector<32x8xf32>, vector<32x8xf32>, vector<32x8xf32>, vector<32x8xf32> -> vector<32x32xf32>
    %c0_22 = arith.constant 0 : index
    %c0_23 = arith.constant 0 : index
    %79 = vector.load %arg4[%c0_22, %c0_23] : memref<32x32xf32, #tpu.memory_space<vmem>>, vector<32x32xf32>
    %cst_24 = arith.constant dense<0.000000e+00> : vector<32x32xf32>
    %80 = tpu.matmul %78, %79, %cst_24 {dimension_numbers = #tpu.dot_dimension_numbers<[1], [0], [0], [1], [0, 0, 1, 1], [], []>} : vector<32x32xf32>, vector<32x32xf32>, vector<32x32xf32> -> vector<32x32xf32>
    %c0_25 = arith.constant 0 : index
    %c0_26 = arith.constant 0 : index
    %81 = vector.load %arg5[%c0_25, %c0_26] : memref<1x32xf32, #tpu.memory_space<vmem>>, vector<1x32xf32>
    %82 = vector.broadcast %81 : vector<1x32xf32> to vector<32x32xf32>
    %83 = arith.addf %80, %82 : vector<32x32xf32>
    %84 = vector.shape_cast %83 : vector<32x32xf32> to vector<4x8x32xf32>
    %c0_27 = arith.constant 0 : index
    %c0_28 = arith.constant 0 : index
    %c0_29 = arith.constant 0 : index
    %85 = vector.load %arg8[%c0_27, %c0_28, %c0_29] : memref<4x8x32xf32, #tpu.memory_space<vmem>>, vector<4x8x32xf32>
    tpu.vector_store %arg8[%c0_27, %c0_28, %c0_29], %84 {strides = array<i32>} : memref<4x8x32xf32, #tpu.memory_space<vmem>>, vector<4x8x32xf32>,
    return
  }
  func.func @transform_0(%arg0: i32) -> (i32, i32, i32) {
    %c0_i32 = arith.constant 0 : i32
    %c0_i32_0 = arith.constant 0 : i32
    %c0_i32_1 = arith.constant 0 : i32
    return %arg0, %c0_i32, %c0_i32_0 : i32, i32, i32
  }
  func.func @transform_1(%arg0: i32) -> (i32, i32) {
    %c0_i32 = arith.constant 0 : i32
    %c0_i32_0 = arith.constant 0 : i32
    %c0_i32_1 = arith.constant 0 : i32
    return %c0_i32, %c0_i32_0 : i32, i32
  }
  func.func @transform_2(%arg0: i32) -> (i32, i32) {
    %c0_i32 = arith.constant 0 : i32
    %c0_i32_0 = arith.constant 0 : i32
    %c0_i32_1 = arith.constant 0 : i32
    return %c0_i32, %c0_i32_0 : i32, i32
  }
  func.func @transform_3(%arg0: i32) -> (i32, i32) {
    %c0_i32 = arith.constant 0 : i32
    %c0_i32_0 = arith.constant 0 : i32
    %c0_i32_1 = arith.constant 0 : i32
    return %c0_i32, %c0_i32_0 : i32, i32
  }
  func.func @transform_4(%arg0: i32) -> (i32, i32) {
    %c0_i32 = arith.constant 0 : i32
    %c0_i32_0 = arith.constant 0 : i32
    %c0_i32_1 = arith.constant 0 : i32
    return %c0_i32, %c0_i32_0 : i32, i32
  }
  func.func @transform_5(%arg0: i32) -> (i32, i32, i32, i32) {
    %c0_i32 = arith.constant 0 : i32
    %c0_i32_0 = arith.constant 0 : i32
    %c0_i32_1 = arith.constant 0 : i32
    %c0_i32_2 = arith.constant 0 : i32
    %c0_i32_3 = arith.constant 0 : i32
    return %c0_i32, %c0_i32_0, %c0_i32_1, %c0_i32_2 : i32, i32, i32, i32
  }
  func.func @transform_6(%arg0: i32) -> (i32, i32, i32, i32) {
    %c0_i32 = arith.constant 0 : i32
    %c0_i32_0 = arith.constant 0 : i32
    %c0_i32_1 = arith.constant 0 : i32
    %c0_i32_2 = arith.constant 0 : i32
    %c0_i32_3 = arith.constant 0 : i32
    return %c0_i32, %c0_i32_0, %c0_i32_1, %c0_i32_2 : i32, i32, i32, i32
  }
  func.func @transform_7(%arg0: i32) -> (i32, i32, i32) {
    %c0_i32 = arith.constant 0 : i32
    %c0_i32_0 = arith.constant 0 : i32
    %c0_i32_1 = arith.constant 0 : i32
    return %arg0, %c0_i32, %c0_i32_0 : i32, i32, i32
  }
}

</mosaic_0001>

<bundles_post_ra>
// kernel: tpu_custom_call.1
= control target key start
LH: loop header
LB: loop body
LE: loop exit
PB: predicated region body
PF: predicated region fallthrough
CT: control target
= control target key end

     0   :  { %s3859_s0 = inlined_call_operand.hbm [shape: f32[8,8,32], index: 0, kind: input, shape index: {}]   ;;  %s3860_s1 = inlined_call_operand.hbm [shape: f32[32,96], index: 1, kind: input, shape index: {}]   ;;  %s3861_s2 = inlined_call_operand.vmem [shape: f32[1,96], index: 2, kind: input, shape index: {}]   ;;  %s3862_s3 = inlined_call_operand.hbm [shape: f32[32,32], index: 3, kind: input, shape index: {}]   ;;  %s3863_s4 = inlined_call_operand.vmem [shape: f32[1,32], index: 4, kind: input, shape index: {}]   ;;  %s3864_s5 = inlined_call_operand.hbm [shape: f32[4,1,8,8], index: 5, kind: input, shape index: {}]   ;;  %s3865_s6 = inlined_call_operand.hbm [shape: f32[4,1,8,8], index: 6, kind: input, shape index: {}]   ;;  %s3866_s7 = inlined_call_operand.hbm [shape: f32[8,8,32], index: 7, kind: output, shape index: {}]  }
   0x1   :  { %3869 = sst [smem:[#allocation16_spill]] %s3860_s1 }
   0x2   :  { %12 = vsyncpa [#allocation3], 0 }
   0x3   :  { %14 = vsyncpa [#allocation3 + $0x1], 0 }
   0x4   :  { %15 = vsyncpa [#allocation6], 0 }
   0x5   :  { %16 = vsyncpa [#allocation9], 0 }
   0x6   :  { %17 = vsyncpa [#allocation4], 0 }
   0x7   :  { %19 = vsyncpa [#allocation4 + $0x1], 0  ;;  %s2977_s24 = smov 0   ;;  %s2979_s25 = smov 0  }
   0x8   :  { %s2981_s26 = smov 0   ;;  %s2983_s27 = smov 0  }
   0x9 LB: > { %s2998_s28 = sadd.s32 4294967295, %s2920_s27   ;;  %s2344_s29 = sadd.s32 4294967294, %s2920_s27   ;;  %s2920_s27 = sphi %s2983_s27, %s3891_s27   ;;  %s2916_s26 = sphi %s2981_s26, %s3890_s26   ;;  %s2912_s25 = sphi %s2979_s25, %s3889_s25   ;;  %s2908_s24 = sphi %s2977_s24, %s3888_s24  }
   0xa   : > { %p45_p0 = scmp.ne.s32.totalorder %s2912_s25, %s2908_s24  ;;  %p46_p1 = scmp.eq.s32.totalorder %s2998_s28, 0 }
   0xb   : > { %p195_p2 = scmp.eq.s32.totalorder %s2998_s28, 1  ;;  %p201_p3 = scmp.eq.s32.totalorder %s2344_s29, 1 }
   0xc   : > { %p3007_p4 = por %p46_p1, %p45_p0  ;;  %p2345_p5 = scmp.ge.s32.totalorder %s2920_s27, 1 }
   0xd   : > { %p3012_p6 = por %p201_p3, %p45_p0  ;;  %p208_p7 = scmp.lt.s32.totalorder %s2920_s27, 3 }
   0xe   : > { %s3872_s1 = sld [smem:[#allocation16_spill]]  ;;  %s2922_s13 = smov [#allocation5]  }
   0xf   : > { %p3020_p8 = pnand %p2345_p5, %p208_p7  ;;  %s221_s14 = sshll.u32 %s2922_s13, 4  ;;  %s222_s14 = int_to_ptr.vmem [resolvable:$true] %s221_s14 }
  0x10   : > { %s253_s18 = sshll.u32 %s3864_s5, 4  ;;  %s3867_s19 = smov 128   ;;  %s254_s18 = int_to_ptr.hbm [resolvable:$true] %s253_s18 }
  0x11   : > { %p2448_p9 = pneg %p3020_p8  ;;  %s3868_s20 = smov 8  }
  0x12   : > { %s2925_s21 = smov [#allocation8]   ;;  %s236_s9 = sshll.u32 %s3862_s3, 4  ;;  %s237_s9 = int_to_ptr.hbm [resolvable:$true] %s236_s9 }
  0x13   : > { %p3028_p10 = pnand %p2448_p9, %p46_p1  ;;  %s255_s22 = sshll.u32 %s2925_s21, 4  ;;  %s256_s22 = int_to_ptr.vmem [resolvable:$true] %s255_s22 }
  0x14   : > { %s219_s11 = sshll.u32 %s3872_s1, 4  ;;  %s267_s13 = sshll.u32 %s3865_s6, 4  ;;  %s220_s11 = int_to_ptr.hbm [resolvable:$true] %s219_s11  ;;  %s268_s13 = int_to_ptr.hbm [resolvable:$true] %s267_s13 }
  0x15   : > { %2451 = dma.hbm_to_vmem [thread:$0]  (!%p3028_p10), %s220_s11, 512, %s222_s14, [#allocation6], %s3867_s19, %s3867_s19, %s3868_s20  }
  0x16   : > { %2457 = dma.hbm_to_vmem [thread:$0]  (!%p3028_p10), %s254_s18, 512, %s256_s22, [#allocation9], %s3867_s19, %s3867_s19, %s3868_s20  }
  0x17   : > { %s2926_s14 = smov [#allocation7]   ;;  %s2927_s17 = smov [#allocation10]  }
  0x18   : > { %s238_s16 = sshll.u32 %s2926_s14, 4  ;;  %s269_s18 = sshll.u32 %s2927_s17, 4  ;;  %s239_s16 = int_to_ptr.vmem [resolvable:$true] %s238_s16  ;;  %s270_s18 = int_to_ptr.vmem [resolvable:$true] %s269_s18 }
  0x19   : > { %2454 = dma.hbm_to_vmem [thread:$0]  (!%p3028_p10), %s237_s9, 512, %s239_s16, [#allocation6], %s3867_s19, %s3867_s19, %s3868_s20  }
  0x1a   : > { %2460 = dma.hbm_to_vmem [thread:$0]  (!%p3028_p10), %s268_s13, 512, %s270_s18, [#allocation9], %s3867_s19, %s3867_s19, %s3868_s20  }
  0x1b   : > { %s3063_s21 = sadd.s32 1, %s2920_s27   ;;  %s32_s22 = sadd.s32 1, %s2916_s26 }
  0x1c   : > { %s29_s23 = ssub.s32 %s2920_s27, %s3063_s21  ;;  %p39_p12 = scmp.ne.s32.totalorder %s2916_s26, %s2912_s25 }
  0x1d   : > { %p30_p13 = scmp.eq.s32.totalorder %s29_s23, 0  ;;  %p40_p0 = scmp.eq.s32.totalorder %s2920_s27, 0 }
  0x1e   : > { %p3073_p3 = por %p195_p2, %p39_p12  ;;  %p2473_p5 = scmp.lt.s32.totalorder %s2920_s27, 2 }
  0x1f   : > { %s3079_s9 = scalar_select %p30_p13, %s2916_s26, %s32_s22  }
  0x20   : > { %p41_p7 = por %p40_p0, %p39_p12  ;;  %s283_s15 = sand.u32 1, %s2916_s26  }
  0x21   : > { %s2351_s10 = sshll.u32 %s283_s15, 5  ;;  %s2422_s11 = sshll.u32 %s2920_s27, 5 }
  0x22   : > { %s292_s16 = scalar_lea.hbm %s3859_s0, %s2422_s11  ;;  %s287_s17 = scalar_lea.vmem [#allocation2], %s2351_s10 }
  0x23   : > { %s295_s18 = sshll.u32 %s287_s17, 4  ;;  %s293_s23 = sshll.u32 %s292_s16, 4  ;;  %s296_s18 = int_to_ptr.vmem [resolvable:$true] %s295_s18  ;;  %s294_s23 = int_to_ptr.hbm [resolvable:$true] %s293_s23 }
  0x24   : > { %p3086_p2 = pnand %p2473_p5, %p41_p7  ;;  %s284_s22 = scalar_lea.sflag [#allocation3], %s283_s15 }
  0x25   : > { %s2816_s20 = sshra.s32 %s294_s23, 4  ;;  %s2823_s13 = scalar_lea.hbm %s3859_s0, 64  ;;  %s2817_s20 = int_to_ptr.hbm [resolvable:$true] %s2816_s20 }
  0x26   : > { %s2818_s1 = scalar_lea.hbm %s2817_s20, 32  ;;  %p2820_p10 = pneg %p3086_p2 }
  0x27   : > { %p2819_p9 = scmp.ne.s32.totalorder %s2817_s20, %s2818_s1  ;;  %p2824_p0 = scmp.lt.s32.totalorder %s2817_s20, %s3859_s0 }
  0x28   : > { %p2825_p5 = scmp.lt.s32.totalorder %s2823_s13, %s2818_s1 }
  0x29   : > { %p2821_p12 = pnand %p2820_p10, %p2819_p9 }
  0x2a   : > { %p2826_p7 = por %p2825_p5, %p2824_p0 }
  0x2b   : > { %p2822_p13 = pneg %p2821_p12 }
  0x2d   : > { %p2827_p11 = pnand %p2826_p7, %p2822_p13 }
  0x2f   : > { %2830 = shalt.err (!%p2827_p11)
}
  0x30   : > { %s3877_s15 = smov 8   ;;  %s3878_s17 = smov 128  }
  0x31   : > { %2464 = dma.hbm_to_vmem [thread:$0]  (!%p3086_p2), %s294_s23, 512, %s296_s18, %s284_s22, %s3878_s17, %s3878_s17, %s3877_s15  }
  0x32   : > { %307 = sbr.rel (%p3020_p8) target bundleno = 1900 (0x76c), region = 48  ;;  %s3106_s11 = sand.u32 (!%p3020_p8), 1, %s2912_s25  }
  0x33   : > { %s2355_s1 = sshll.u32 (!%p3020_p8), %s3106_s11, 5  ;;  %s310_s20 = scalar_lea.sflag (!%p3020_p8), [#allocation3], %s3106_s11 }
  0x34   : > { %s313_s10 = scalar_lea.vmem (!%p3020_p8), [#allocation2], %s2355_s1 }
  0x37   : > { %2891 = dma.done.wait (%p3007_p4), %s310_s20, 512  }
  0x38   : > { %2893 = vsyncadd (%p3007_p4), %s310_s20, 4294966784 }
  0x39   : > { %2895 = dma.done.wait (%p46_p1), [#allocation6], 1024  }
  0x3a   : > { %2897 = vsyncadd (%p46_p1), [#allocation6], 4294966272 }
  0x3b   : > { %2899 = dma.done.wait (%p46_p1), [#allocation9], 1024  }
  0x3c   : > { %2901 = vsyncadd (%p46_p1), [#allocation9], 4294966272  ;;  %v374_v0 = vld [vmem:[#allocation5 + $0x18] sm:$0xff]  ;;  %v373_v1 = vld [vmem:[#allocation5 + $0x10] sm:$0xff]  ;;  %vm379_vm0 = vcmask 261120   ;;  %s2928_s19 = smov 104  }
  0x3d   : > { %404 = vmatpush.msra.mxu0 %v374_v0  ;;  %v372_v2 = vld [vmem:[#allocation5 + $0x8] sm:$0xff]  ;;  %v371_v3 = vld [vmem:[#allocation5] sm:$0xff]  ;;  %v369_v6 = vld [vmem:[%s313_s10 + $0x10] sm:$0xff]  ;;  %s2929_s18 = smov 112   ;;  %s2930_s23 = smov 120   ;;  %vm477_vm1 = vcmask 64512  }
  0x3e   : > { %v367_v4 = vld [vmem:[%s313_s10] sm:$0xff]  ;;  %v368_v5 = vld [vmem:[%s313_s10 + $0x8] sm:$0xff]  ;;  %v370_v7 = vld [vmem:[%s313_s10 + $0x18] sm:$0xff]  ;;  %s2931_s22 = smov 96   ;;  %s2932_s13 = smov 64  }
  0x3f   : > { %405 = vmatpush.msra.mxu0 %v373_v1  ;;  %v2566_v8 = vld [vmem:[%s3861_s2] ss:$0 sm:$0xff]  ;;  %s2933_s14 = smov 8   ;;  %s2934_s16 = smov 16  }
  0x40   : > { %s2935_s15 = smov 24   ;;  %s364_s10 = scalar_lea.vmem [#allocation11], %s2355_s1 }
  0x41   : > { %406 = vmatpush.msra.mxu0 %v372_v2  ;;  %s2423_s30 = sshll.u32 %s2998_s28, 5  ;;  %s2218_s1 = scalar_lea.sflag [#allocation4], %s3106_s11 }
  0x42   : > { %s2866_s17 = scalar_lea.hbm %s3866_s7, 64 }
  0x43   : > { %407 = vmatpush.msra.mxu0 %v371_v3 }
  0x44   : > { %2361 = vmatmul.msk.f32.vlgmr.msra.gmra.mxu0 %vm379_vm0, %v367_v4 }
  0x4c   : > { %2362 = vmatmul.msk.f32.gmra.mxu0 %vm379_vm0, %v368_v5 }
  0x54   : > { %2363 = vmatmul.msk.f32.gmra.mxu0 %vm379_vm0, %v369_v6 }
  0x5c   : > { %2364 = vmatmul.msk.f32.gmra.mxu0 %vm379_vm0, %v370_v7 }
  0xc1   : > { %v409_v9 = vpop.f32.mrf.mxu0 }
  0xc2   : > { %v3131_v10 = vadd.f32 %v2566_v8, %v409_v9 }
  0xc4   : > { %449 = vrot.lane.b32.xlu2 %v3131_v10, %s2928_s19  ;;  %437 = vrot.lane.b32.xlu1 %v3131_v10, %s2929_s18  ;;  %v461_v13 = vmul.f32 %v3131_v10, %v3131_v10 }
  0xc5   : > { %425 = vrot.lane.b32.xlu0 %v3131_v10, %s2930_s23 }
  0xc6   : > { %v478_v20 = vsel %vm477_vm1, %v461_v13, 0.0 }
  0xc9   : > { %v412_v11 = vpop.f32.mrf.mxu0 }
  0xca   : > { %v3138_v12 = vadd.f32 %v2566_v8, %v412_v11 }
  0xcc   : > { %439 = vrot.lane.b32.xlu1 %v3138_v12, %s2929_s18  ;;  %734 = vrot.lane.b32.xlu2 %v461_v13, %s2931_s22  ;;  %v462_v14 = vmul.f32 %v3138_v12, %v3138_v12 }
  0xcd   : > { %427 = vrot.lane.b32.xlu0 %v3138_v12, %s2930_s23 }
  0xce   : > { %v481_v25 = vsel %vm477_vm1, %v462_v14, 0.0 }
  0xd1   : > { %v415_v15 = vpop.f32.mrf.mxu0 }
  0xd2   : > { %v3149_v16 = vadd.f32 %v2566_v8, %v415_v15 }
  0xd4   : > { %736 = vrot.lane.b32.xlu1 %v462_v14, %s2931_s22  ;;  %v463_v17 = vmul.f32 %v3149_v16, %v3149_v16 }
  0xd6   : > { %738 = vrot.lane.b32.xlu0 %v463_v17, %s2931_s22  ;;  %v484_v21 = vsel %vm477_vm1, %v463_v17, 0.0 }
  0xd9   : > { %v418_v18 = vpop.f32.mrf.mxu0 }
  0xda   : > { %v3155_v19 = vadd.f32 %v2566_v8, %v418_v18 }
  0xdc   : > { %453 = vrot.lane.b32.xlu1 %v3149_v16, %s2928_s19  ;;  %v464_v22 = vmul.f32 %v3155_v19, %v3155_v19 }
  0xde   : > { %443 = vrot.lane.b32.xlu0 %v3155_v19, %s2929_s18  ;;  %v487_v36 = vsel %vm477_vm1, %v464_v22, 0.0 }
  0xe6   : > { %455 = vrot.lane.b32.xlu0 %v3155_v19, %s2928_s19 }
  0xf5   : > { %479 = vadd.xlane.f32.xlu2 %v478_v20 }
 0x106   : > { %485 = vadd.xlane.f32.xlu1 %v484_v21 }
 0x10d   : > { %451 = vrot.lane.b32.xlu2 %v3138_v12, %s2928_s19 }
 0x11e   : > { %v3169_v23 = vpop.permute.xlu2 %449 }
 0x11f   : > { %431 = vrot.lane.b32.xlu1 %v3155_v19, %s2930_s23  ;;  %v3173_v24 = vmul.f32 %v3169_v23, %v3169_v23 }
 0x126   : > { %v735_v31 = vpop.permute.xlu2 %734 }
 0x127   : > { %740 = vrot.lane.b32.xlu1 %v464_v22, %s2931_s22  ;;  %v782_v32 = vsel %vm477_vm1, %v735_v31, 0.0 }
 0x12f   : > { %758 = vrot.lane.b32.xlu1 %v3173_v24, %s2931_s22 }
 0x136   : > { %482 = vadd.xlane.f32.xlu2 %v481_v25  ;;  %v3183_v28 = vpop.permute.xlu1 %437 }
 0x137   : > { %v3178_v26 = vpop.permute.xlu0 %425  ;;  %v469_v29 = vmul.f32 %v3183_v28, %v3183_v28 }
 0x138   : > { %v465_v27 = vmul.f32 %v3178_v26, %v3178_v26 }
 0x139   : > { %v502_v37 = vsel %vm477_vm1, %v469_v29, 0.0 }
 0x13a   : > { %742 = vrot.lane.b32.xlu0 %v465_v27, %s2931_s22  ;;  %v490_v30 = vsel %vm477_vm1, %v465_v27, 0.0 }
 0x13e   : > { %v3204_v39 = vpop.permute.xlu1 %439 }
 0x13f   : > { %v3194_v33 = vpop.permute.xlu0 %427  ;;  %v470_v40 = vmul.f32 %v3204_v39, %v3204_v39 }
 0x140   : > { %v466_v34 = vmul.f32 %v3194_v33, %v3194_v33 }
 0x141   : > { %v505_v58 = vsel %vm477_vm1, %v470_v40, 0.0 }
 0x142   : > { %750 = vrot.lane.b32.xlu0 %v469_v29, %s2931_s22  ;;  %v493_v35 = vsel %vm477_vm1, %v466_v34, 0.0 }
 0x146   : > { %v737_v49 = vpop.permute.xlu1 %736 }
 0x147   : > { %v785_v54 = vsel %vm477_vm1, %v737_v49, 0.0 }
 0x148   : > { %v739_v50 = vpop.permute.xlu0 %738 }
 0x149   : > { %v788_v60 = vsel %vm477_vm1, %v739_v50, 0.0 }
 0x14e   : > { %429 = vrot.lane.b32.xlu2 %v3149_v16, %s2930_s23  ;;  %v3229_v51 = vpop.permute.xlu1 %453  ;;  %s2230_s23 = sshll.u32 %s364_s10, 4  ;;  %s2231_s23 = int_to_ptr.vmem [resolvable:$true] %s2230_s23 }
 0x14f   : > { %v475_v61 = vmul.f32 %v3229_v51, %v3229_v51 }
 0x150   : > { %v3231_v52 = vpop.permute.xlu0 %443 }
 0x151   : > { %v3235_v53 = vmul.f32 %v3231_v52, %v3231_v52  ;;  %v520_v63 = vsel %vm477_vm1, %v475_v61, 0.0 }
 0x156   : > { %441 = vrot.lane.b32.xlu2 %v3149_v16, %s2929_s18  ;;  %s2229_s18 = scalar_lea.hbm %s3866_s7, %s2423_s30 }
 0x158   : > { %v3242_v56 = vpop.permute.xlu0 %455 }
 0x159   : > { %491 = vadd.xlane.f32.xlu1 %v490_v30  ;;  %v3246_v57 = vmul.f32 %v3242_v56, %v3242_v56 }
 0x168   : > { %v3202_v38 = vpop.xlane.xlu2 %479 }
 0x16c   : > { %783 = vadd.xlane.f32.xlu0 %v782_v32 }
 0x170   : > { %v3209_v41 = vpop.permute.xlu2 %451 }
 0x171   : > { %v3213_v42 = vmul.f32 %v3209_v41, %v3209_v41 }
 0x172   : > { %744 = vrot.lane.b32.xlu1 %v466_v34, %s2931_s22 }
 0x174   : > { %494 = vadd.xlane.f32.xlu0 %v493_v35 }
 0x179   : > { %v3240_v55 = vpop.xlane.xlu1 %485 }
 0x17f   : > { %488 = vadd.xlane.f32.xlu2 %v487_v36 }
 0x187   : > { %503 = vadd.xlane.f32.xlu2 %v502_v37 }
 0x191   : > { %v3251_v59 = vpop.permute.xlu1 %431 }
 0x192   : > { %v468_v0 = vmul.f32 %v3251_v59, %v3251_v59 }
 0x194   : > { %v499_v2 = vsel %vm477_vm1, %v468_v0, 0.0 }
 0x199   : > { %v741_v62 = vpop.permute.xlu1 %740 }
 0x19f   : > { %752 = vrot.lane.b32.xlu2 %v470_v40, %s2931_s22 }
 0x1a1   : > { %v3262_v3 = vpop.permute.xlu1 %758 }
 0x1a7   : > { %760 = vrot.lane.b32.xlu2 %v3213_v42, %s2931_s22 }
 0x1a9   : > { %v3217_v43 = vpop.xlane.xlu2 %482 }
 0x1ac   : > { %v3259_v1 = vpop.permute.xlu0 %742 }
 0x1b1   : > { %v3219_v44 = vpop.permute.xlu2 %429 }
 0x1b2   : > { %v467_v45 = vmul.f32 %v3219_v44, %v3219_v44 }
 0x1b4   : > { %746 = vrot.lane.b32.xlu1 %v467_v45, %s2931_s22  ;;  %v751_v4 = vpop.permute.xlu0 %750  ;;  %v496_v20 = vsel %vm477_vm1, %v467_v45, 0.0 }
 0x1b5   : > { %v806_v6 = vsel %vm477_vm1, %v751_v4, 0.0 }
 0x1b9   : > { %v3224_v46 = vpop.permute.xlu2 %441 }
 0x1ba   : > { %v471_v47 = vmul.f32 %v3224_v46, %v3224_v46 }
 0x1bc   : > { %v508_v48 = vsel %vm477_vm1, %v471_v47, 0.0 }
 0x1bd   : > { %509 = vadd.xlane.f32.xlu0 %v508_v48 }
 0x1cc   : > { %v3268_v7 = vpop.xlane.xlu1 %491 }
 0x1d0   : > { %786 = vadd.xlane.f32.xlu2 %v785_v54 }
 0x1d1   : > { %756 = vrot.lane.b32.xlu0 %v3235_v53, %s2931_s22 }
 0x1d8   : > { %506 = vadd.xlane.f32.xlu2 %v505_v58 }
 0x1d9   : > { %764 = vrot.lane.b32.xlu0 %v3246_v57, %s2931_s22 }
 0x1de   : > { %789 = vadd.xlane.f32.xlu1 %v788_v60 }
 0x1df   : > { %v784_v15 = vpop.xlane.xlu0 %783 }
 0x1e0   : > { %v830_v17 = vmax.f32 %v784_v15, 1e-24 }
 0x1e2   : > { %2568 = vrsqrt.f32 %v830_v17  ;;  %vm852_vm3 = vweird.f32 %v830_v17 }
 0x1e4   : > { %v745_v9 = vpop.permute.xlu1 %744 }
 0x1e5   : > { %v797_v11 = vsel %vm477_vm1, %v745_v9, 0.0 }
 0x1e6   : > { %521 = vadd.xlane.f32.xlu1 %v520_v63 }
 0x1e7   : > { %v3277_v31 = vpop.xlane.xlu0 %494 }
 0x1e8   : > { %v2569_v18 = vpop.eup %2568 }
 0x1e9   : > { %v847_v21 = vmul.f32 %v2569_v18, %v830_v17  ;;  %vm853_vm2 = vweird.f32 %v2569_v18 }
 0x1ea   : > { %vm854_vm4 = vmor %vm852_vm3, %vm853_vm2 }
 0x1eb   : > { %v848_v25 = vmul.f32 %v2569_v18, %v847_v21 }
 0x1ed   : > { %v849_v29 = vmul.f32 0.5, %v848_v25 }
 0x1ee   : > { %500 = vadd.xlane.f32.xlu1 %v499_v2 }
 0x1ef   : > { %v850_v30 = vsub.f32 1.5, %v849_v29 }
 0x1f0   : > { %754 = vrot.lane.b32.xlu2 %v471_v47, %s2931_s22 }
 0x1f1   : > { %v851_v32 = vmul.f32 %v2569_v18, %v850_v30 }
 0x1f2   : > { %v3265_v5 = vpop.xlane.xlu2 %488 }
 0x1f3   : > { %v855_v34 = vsel %vm854_vm4, %v2569_v18, %v851_v32 }
 0x1f4   : > { %v1006_v35 = vmul.f32 %v855_v34, %v3131_v10 }
 0x1f6   : > { %807 = vadd.xlane.f32.xlu1 %v806_v6  ;;  %v511_v6 = vsel %vm477_vm1, %v3235_v53, 0.0 }
 0x1f8   : > { %762 = vrot.lane.b32.xlu2 %v475_v61, %s2931_s22  ;;  %v791_v61 = vsel %vm477_vm1, %v741_v62, 0.0 }
 0x1fa   : > { %v3271_v8 = vpop.xlane.xlu2 %503 }
 0x202   : > { %v753_v13 = vpop.permute.xlu2 %752 }
 0x203   : > { %798 = vadd.xlane.f32.xlu0 %v797_v11  ;;  %v809_v14 = vsel %vm477_vm1, %v753_v13, 0.0  ;;  %v794_v11 = vsel %vm477_vm1, %v3259_v1, 0.0  ;;  %v818_v13 = vsel %vm477_vm1, %v3262_v3, 0.0  ;;  %v526_v1 = vmax.f32 %v3202_v38, 1e-24 }
 0x205   : > { %vm548_vm9 = vweird.f32 %v526_v1 }
 0x20a   : > { %v761_v2 = vpop.permute.xlu2 %760 }
 0x20b   : > { %810 = vadd.xlane.f32.xlu0 %v809_v14  ;;  %v821_v15 = vsel %vm477_vm1, %v761_v2, 0.0 }
 0x221   : > { %497 = vadd.xlane.f32.xlu2 %v496_v20 }
 0x226   : > { %v747_v22 = vpop.permute.xlu1 %746 }
 0x227   : > { %v800_v27 = vsel %vm477_vm1, %v747_v22, 0.0 }
 0x228   : > { %801 = vadd.xlane.f32.xlu0 %v800_v27 }
 0x230   : > { %v3281_v36 = vpop.xlane.xlu0 %509 }
 0x239   : > { %748 = vrot.lane.b32.xlu2 %v468_v0, %s2931_s22 }
 0x23c   : > { %1023 = vrot.lane.b32.xlu0 %v1006_v35, %s2931_s22 }
 0x243   : > { %v757_v37 = vpop.permute.xlu0 %756  ;;  %v3290_v9 = vpop.xlane.xlu2 %786 }
 0x24b   : > { %v765_v40 = vpop.permute.xlu0 %764  ;;  %v3294_v62 = vpop.xlane.xlu2 %506 }
 0x24c   : > { %v827_v45 = vsel %vm477_vm1, %v765_v40, 0.0 }
 0x24d   : > { %828 = vadd.xlane.f32.xlu1 %v827_v45 }
 0x251   : > { %v790_v47 = vpop.xlane.xlu1 %789 }
 0x252   : > { %v832_v48 = vmax.f32 %v790_v47, 1e-24 }
 0x253   : > { %v755_v17 = vpop.permute.xlu2 %754 }
 0x254   : > { %2570 = vrsqrt.f32 %v832_v48  ;;  %vm872_vm6 = vweird.f32 %v832_v48  ;;  %v812_v53 = vsel %vm477_vm1, %v755_v17, 0.0  ;;  %v528_v17 = vmax.f32 %v3240_v55, 1e-24 }
 0x255   : > { %2572 = vrsqrt.f32 %v526_v1 }
 0x256   : > { %vm568_vm3 = vweird.f32 %v528_v17 }
 0x259   : > { %v3298_v14 = vpop.xlane.xlu1 %521 }
 0x25a   : > { %v2571_v49 = vpop.eup %2570 }
 0x25b   : > { %v867_v50 = vmul.f32 %v2571_v49, %v832_v48  ;;  %vm873_vm5 = vweird.f32 %v2571_v49  ;;  %v763_v20 = vpop.permute.xlu2 %762  ;;  %v2573_v27 = vpop.eup %2572 }
 0x25c   : > { %vm874_vm7 = vmor %vm872_vm6, %vm873_vm5  ;;  %v824_v21 = vsel %vm477_vm1, %v763_v20, 0.0  ;;  %v543_v30 = vmul.f32 %v2573_v27, %v526_v1  ;;  %vm549_vm8 = vweird.f32 %v2573_v27 }
 0x25d   : > { %v868_v54 = vmul.f32 %v2571_v49, %v867_v50  ;;  %v815_v50 = vsel %vm477_vm1, %v757_v37, 0.0  ;;  %vm550_vm10 = vmor %vm548_vm9, %vm549_vm8 }
 0x25e   : > { %v544_v34 = vmul.f32 %v2573_v27, %v543_v30 }
 0x25f   : > { %v869_v58 = vmul.f32 0.5, %v868_v54 }
 0x260   : > { %v545_v45 = vmul.f32 0.5, %v544_v34 }
 0x261   : > { %v870_v60 = vsub.f32 1.5, %v869_v58  ;;  %v3302_v18 = vpop.xlane.xlu1 %500 }
 0x262   : > { %792 = vadd.xlane.f32.xlu2 %v791_v61  ;;  %v546_v48 = vsub.f32 1.5, %v545_v45 }
 0x263   : > { %v871_v63 = vmul.f32 %v2571_v49, %v870_v60 }
 0x264   : > { %v547_v60 = vmul.f32 %v2573_v27, %v546_v48 }
 0x265   : > { %v875_v0 = vsel %vm874_vm7, %v2571_v49, %v871_v63 }
 0x266   : > { %v1008_v4 = vmul.f32 %v875_v0, %v3149_v16  ;;  %v551_v2 = vsel %vm550_vm10, %v2573_v27, %v547_v60 }
 0x268   : > { %1079 = vrot.lane.b32.xlu1 %v1008_v4, %s2931_s22 }
 0x269   : > { %v808_v25 = vpop.xlane.xlu1 %807 }
 0x26a   : > { %512 = vadd.xlane.f32.xlu2 %v511_v6  ;;  %v838_v29 = vmax.f32 %v808_v25, 1e-24  ;;  %v702_v6 = vmul.f32 %v551_v2, %v3131_v10 }
 0x26c   : > { %2574 = vrsqrt.f32 %v838_v29  ;;  %vm932_vm12 = vweird.f32 %v838_v29 }
 0x272   : > { %795 = vadd.xlane.f32.xlu2 %v794_v11  ;;  %v2575_v47 = vpop.eup %2574 }
 0x273   : > { %v927_v49 = vmul.f32 %v2575_v47, %v838_v29  ;;  %vm933_vm11 = vweird.f32 %v2575_v47 }
 0x274   : > { %vm934_vm13 = vmor %vm932_vm12, %vm933_vm11 }
 0x275   : > { %v928_v58 = vmul.f32 %v2575_v47, %v927_v49 }
 0x276   : > { %v799_v3 = vpop.xlane.xlu0 %798 }
 0x277   : > { %v835_v38 = vmax.f32 %v799_v3, 1e-24  ;;  %v929_v63 = vmul.f32 0.5, %v928_v58 }
 0x279   : > { %2576 = vrsqrt.f32 %v835_v38  ;;  %v930_v11 = vsub.f32 1.5, %v929_v63  ;;  %vm902_vm15 = vweird.f32 %v835_v38 }
 0x27a   : > { %819 = vadd.xlane.f32.xlu2 %v818_v13  ;;  %2578 = vrsqrt.f32 %v528_v17 }
 0x27e   : > { %v3309_v40 = vpop.xlane.xlu0 %810 }
 0x27f   : > { %v2577_v61 = vpop.eup %2576 }
 0x280   : > { %v897_v0 = vmul.f32 %v2577_v61, %v835_v38  ;;  %vm903_vm14 = vweird.f32 %v2577_v61  ;;  %v2579_v25 = vpop.eup %2578 }
 0x281   : > { %vm904_vm2 = vmor %vm902_vm15, %vm903_vm14  ;;  %v563_v30 = vmul.f32 %v2579_v25, %v528_v17  ;;  %vm569_vm4 = vweird.f32 %v2579_v25 }
 0x282   : > { %822 = vadd.xlane.f32.xlu2 %v821_v15  ;;  %v898_v13 = vmul.f32 %v2577_v61, %v897_v0  ;;  %v931_v15 = vmul.f32 %v2575_v47, %v930_v11  ;;  %vm570_vm5 = vmor %vm568_vm3, %vm569_vm4 }
 0x283   : > { %v564_v55 = vmul.f32 %v2579_v25, %v563_v30 }
 0x284   : > { %v899_v37 = vmul.f32 0.5, %v898_v13  ;;  %v935_v1 = vsel %vm934_vm13, %v2575_v47, %v931_v15 }
 0x285   : > { %v1014_v20 = vmul.f32 %v935_v1, %v3183_v28  ;;  %v565_v29 = vmul.f32 0.5, %v564_v55 }
 0x287   : > { %v566_v34 = vsub.f32 1.5, %v565_v29 }
 0x289   : > { %v567_v45 = vmul.f32 %v2579_v25, %v566_v34 }
 0x28a   : > { %813 = vadd.xlane.f32.xlu2 %v812_v53  ;;  %v900_v53 = vsub.f32 1.5, %v899_v37 }
 0x28b   : > { %v571_v49 = vsel %vm570_vm5, %v2579_v25, %v567_v45 }
 0x28c   : > { %v704_v60 = vmul.f32 %v571_v49, %v3149_v16 }
 0x292   : > { %825 = vadd.xlane.f32.xlu2 %v824_v21  ;;  %v901_v21 = vmul.f32 %v2577_v61, %v900_v53 }
 0x294   : > { %v3306_v22 = vpop.xlane.xlu2 %497  ;;  %v905_v3 = vsel %vm904_vm2, %v2577_v61, %v901_v21 }
 0x295   : > { %v1011_v27 = vmul.f32 %v905_v3, %v3194_v33 }
 0x29b   : > { %v802_v54 = vpop.xlane.xlu0 %801 }
 0x29c   : > { %v749_v32 = vpop.permute.xlu2 %748 }
 0x29d   : > { %v803_v35 = vsel %vm477_vm1, %v749_v32, 0.0  ;;  %v836_v32 = vmax.f32 %v802_v54, 1e-24 }
 0x29e   : > { %804 = vadd.xlane.f32.xlu2 %v803_v35 }
 0x29f   : > { %2580 = vrsqrt.f32 %v836_v32  ;;  %vm912_vm10 = vweird.f32 %v836_v32 }
 0x2a5   : > { %v2581_v48 = vpop.eup %2580 }
 0x2a6   : > { %816 = vadd.xlane.f32.xlu2 %v815_v50  ;;  %v907_v58 = vmul.f32 %v2581_v48, %v836_v32  ;;  %vm913_vm9 = vweird.f32 %v2581_v48 }
 0x2a7   : > { %vm914_vm11 = vmor %vm912_vm10, %vm913_vm9 }
 0x2a8   : > { %v908_v63 = vmul.f32 %v2581_v48, %v907_v58 }
 0x2ae   : > { %v1024_v4 = vpop.permute.xlu0 %1023 }
 0x2af   : > { %2365 = vmatpush.xpose.msk.msra.mxu3 %vm477_vm1, %v1024_v4  ;;  %v909_v4 = vmul.f32 0.5, %v908_v63  ;;  %v531_v63 = vmax.f32 %v3277_v31, 1e-24 }
 0x2b1   : > { %v910_v15 = vsub.f32 1.5, %v909_v4 }
 0x2b2   : > { %2366 = vmatmul.msk.f32.vlgmr.msra.gmra.mxu3 %vm477_vm1, %v702_v6 }
 0x2be   : > { %1247 = vrot.lane.b32.xlu2 %v1014_v20, %s2931_s22  ;;  %v911_v20 = vmul.f32 %v2581_v48, %v910_v15 }
 0x2c0   : > { %v3320_v35 = vpop.xlane.xlu1 %828 }
 0x2c6   : > { %1163 = vrot.lane.b32.xlu2 %v1011_v27, %s2931_s22  ;;  %v915_v27 = vsel %vm914_vm11, %v2581_v48, %v911_v20 }
 0x2c7   : > { %v1012_v55 = vmul.f32 %v915_v27, %v3219_v44 }
 0x2d5   : > { %v793_v47 = vpop.xlane.xlu2 %792 }
 0x2d6   : > { %v833_v38 = vmax.f32 %v793_v47, 1e-24  ;;  %v831_v47 = vmax.f32 %v3290_v9, 1e-24 }
 0x2d8   : > { %2582 = vrsqrt.f32 %v833_v38  ;;  %vm882_vm7 = vweird.f32 %v833_v38  ;;  %vm862_vm5 = vweird.f32 %v831_v47 }
 0x2da   : > { %v1080_v50 = vpop.permute.xlu1 %1079 }
 0x2db   : > { %2369 = vmatpush.xpose.msk.msrb.mxu3 %vm477_vm1, %v1080_v50 }
 0x2dd   : > { %v3324_v54 = vpop.xlane.xlu2 %512 }
 0x2de   : > { %v2583_v61 = vpop.eup %2582  ;;  %2370 = vmatmul.msk.f32.vlgmr.msrb.gmra.mxu3 %vm477_vm1, %v704_v60 }
 0x2df   : > { %v877_v0 = vmul.f32 %v2583_v61, %v833_v38  ;;  %vm883_vm6 = vweird.f32 %v2583_v61 }
 0x2e0   : > { %vm884_vm8 = vmor %vm882_vm7, %vm883_vm6 }
 0x2e1   : > { %v878_v2 = vmul.f32 %v2583_v61, %v877_v0 }
 0x2e3   : > { %v879_v6 = vmul.f32 0.5, %v878_v2 }
 0x2e5   : > { %v880_v11 = vsub.f32 1.5, %v879_v6  ;;  %v796_v13 = vpop.xlane.xlu2 %795 }
 0x2e6   : > { %v834_v37 = vmax.f32 %v796_v13, 1e-24 }
 0x2e7   : > { %v881_v17 = vmul.f32 %v2583_v61, %v880_v11 }
 0x2e8   : > { %2584 = vrsqrt.f32 %v834_v37  ;;  %vm892_vm13 = vweird.f32 %v834_v37 }
 0x2e9   : > { %v885_v53 = vsel %vm884_vm8, %v2583_v61, %v881_v17  ;;  %2586 = vrsqrt.f32 %v831_v47  ;;  %vm598_vm8 = vweird.f32 %v531_v63 }
 0x2ea   : > { %v1009_v1 = vmul.f32 %v885_v53, %v3155_v19 }
 0x2ec   : > { %1107 = vrot.lane.b32.xlu0 %v1009_v1, %s2931_s22 }
 0x2ed   : > { %v3329_v21 = vpop.xlane.xlu2 %819 }
 0x2ee   : > { %v2585_v3 = vpop.eup %2584 }
 0x2ef   : > { %v887_v25 = vmul.f32 %v2585_v3, %v834_v37  ;;  %vm893_vm12 = vweird.f32 %v2585_v3  ;;  %v2587_v58 = vpop.eup %2586  ;;  %v3342_v37 = vmax.f32 %v3271_v8, 1e-24 }
 0x2f0   : > { %vm894_vm14 = vmor %vm892_vm13, %vm893_vm12  ;;  %v857_v60 = vmul.f32 %v2587_v58, %v831_v47  ;;  %vm863_vm4 = vweird.f32 %v2587_v58 }
 0x2f1   : > { %v888_v30 = vmul.f32 %v2585_v3, %v887_v25  ;;  %vm864_vm6 = vmor %vm862_vm5, %vm863_vm4 }
 0x2f2   : > { %v858_v0 = vmul.f32 %v2587_v58, %v857_v60 }
 0x2f3   : > { %v889_v29 = vmul.f32 0.5, %v888_v30 }
 0x2f4   : > { %1191 = vrot.lane.b32.xlu0 %v1012_v55, %s2931_s22  ;;  %v859_v6 = vmul.f32 0.5, %v858_v0 }
 0x2f5   : > { %v890_v34 = vsub.f32 1.5, %v889_v29  ;;  %v3333_v45 = vpop.xlane.xlu2 %822 }
 0x2f6   : > { %v860_v15 = vsub.f32 1.5, %v859_v6 }
 0x2f7   : > { %v891_v32 = vmul.f32 %v2585_v3, %v890_v34 }
 0x2f8   : > { %v861_v25 = vmul.f32 %v2587_v58, %v860_v15 }
 0x2f9   : > { %v895_v38 = vsel %vm894_vm14, %v2585_v3, %v891_v32 }
 0x2fa   : > { %v1010_v49 = vmul.f32 %v895_v38, %v3178_v26  ;;  %v865_v8 = vsel %vm864_vm6, %v2587_v58, %v861_v25 }
 0x2fb   : > { %v1007_v38 = vmul.f32 %v865_v8, %v3138_v12 }
 0x2fc   : > { %1135 = vrot.lane.b32.xlu1 %v1010_v49, %s2931_s22 }
 0x2fd   : > { %v814_v48 = vpop.xlane.xlu2 %813 }
 0x2fe   : > { %v840_v50 = vmax.f32 %v814_v48, 1e-24 }
 0x300   : > { %2588 = vrsqrt.f32 %v840_v50  ;;  %vm952_vm2 = vweird.f32 %v840_v50 }
 0x301   : > { %2590 = vrsqrt.f32 %v531_v63 }
 0x302   : > { %2592 = vrsqrt.f32 %v3342_v37 }
 0x305   : > { %v3339_v4 = vpop.xlane.xlu2 %825 }
 0x306   : > { %v2589_v61 = vpop.eup %2588 }
 0x307   : > { %v947_v2 = vmul.f32 %v2589_v61, %v840_v50  ;;  %vm953_vm15 = vweird.f32 %v2589_v61  ;;  %v2591_v53 = vpop.eup %2590 }
 0x308   : > { %vm954_vm3 = vmor %vm952_vm2, %vm953_vm15  ;;  %v593_v27 = vmul.f32 %v2591_v53, %v531_v63  ;;  %v2593_v55 = vpop.eup %2592  ;;  %vm599_vm9 = vweird.f32 %v2591_v53 }
 0x309   : > { %v948_v9 = vmul.f32 %v2589_v61, %v947_v2  ;;  %v623_v50 = vmul.f32 %v2593_v55, %v3342_v37  ;;  %vm600_vm12 = vmor %vm598_vm8, %vm599_vm9  ;;  %vm629_vm15 = vweird.f32 %v2593_v55 }
 0x30a   : > { %v594_v30 = vmul.f32 %v2591_v53, %v593_v27 }
 0x30b   : > { %v949_v11 = vmul.f32 0.5, %v948_v9  ;;  %v624_v47 = vmul.f32 %v2593_v55, %v623_v50  ;;  %v3366_v50 = vmax.f32 %v3306_v22, 1e-24 }
 0x30c   : > { %v595_v48 = vmul.f32 0.5, %v594_v30 }
 0x30d   : > { %v950_v13 = vsub.f32 1.5, %v949_v11  ;;  %v625_v15 = vmul.f32 0.5, %v624_v47  ;;  %v3389_v47 = vmax.f32 %v3329_v21, 1e-24 }
 0x30e   : > { %v596_v0 = vsub.f32 1.5, %v595_v48  ;;  %v3363_v48 = vmax.f32 %v3339_v4, 1e-24  ;;  %v3379_v4 = vmax.f32 %v3333_v45, 1e-24  ;;  %v523_v45 = vsel %vm477_vm1, %v3246_v57, 0.0 }
 0x30f   : > { %v951_v17 = vmul.f32 %v2589_v61, %v950_v13  ;;  %v626_v27 = vsub.f32 1.5, %v625_v15 }
 0x310   : > { %v597_v13 = vmul.f32 %v2591_v53, %v596_v0 }
 0x311   : > { %v805_v1 = vpop.xlane.xlu2 %804  ;;  %v955_v31 = vsel %vm954_vm3, %v2589_v61, %v951_v17  ;;  %vm628_vm3 = vweird.f32 %v3342_v37 }
 0x312   : > { %v837_v20 = vmax.f32 %v805_v1, 1e-24  ;;  %v1016_v3 = vmul.f32 %v955_v31, %v3224_v46  ;;  %v601_v25 = vsel %vm600_vm12, %v2591_v53, %v597_v13  ;;  %vm630_vm4 = vmor %vm628_vm3, %vm629_vm15 }
 0x314   : > { %2594 = vrsqrt.f32 %v837_v20  ;;  %1303 = vrot.lane.b32.xlu1 %v1016_v3, %s2931_s22  ;;  %vm922_vm10 = vweird.f32 %v837_v20 }
 0x319   : > { %v817_v29 = vpop.xlane.xlu2 %816 }
 0x31a   : > { %v2595_v34 = vpop.eup %2594  ;;  %v841_v32 = vmax.f32 %v817_v29, 1e-24  ;;  %v627_v29 = vmul.f32 %v2593_v55, %v626_v27  ;;  %v517_v27 = vsel %vm477_vm1, %v3213_v42, 0.0  ;;  %v2526_v42 = vpack.i.bf16 %v3219_v44, %v3149_v16 }
 0x31b   : > { %v917_v49 = vmul.f32 %v2595_v34, %v837_v20  ;;  %vm923_vm7 = vweird.f32 %v2595_v34  ;;  %v707_v20 = vmul.f32 %v601_v25, %v3194_v33 }
 0x31c   : > { %2596 = vrsqrt.f32 %v841_v32  ;;  %1051 = vrot.lane.b32.xlu1 %v1007_v38, %s2931_s22  ;;  %vm924_vm11 = vmor %vm922_vm10, %vm923_vm7  ;;  %vm962_vm14 = vweird.f32 %v841_v32  ;;  %v631_v38 = vsel %vm630_vm4, %v2593_v55, %v627_v29  ;;  %vm992_vm10 = vweird.f32 %v3363_v48 }
 0x31d   : > { %v918_v60 = vmul.f32 %v2595_v34, %v917_v49  ;;  %v710_v49 = vmul.f32 %v631_v38, %v3183_v28 }
 0x31f   : > { %v919_v61 = vmul.f32 0.5, %v918_v60  ;;  %v514_v60 = vsel %vm477_vm1, %v3173_v24, 0.0 }
 0x321   : > { %v920_v2 = vsub.f32 1.5, %v919_v61  ;;  %v1248_v58 = vpop.permute.xlu2 %1247  ;;  %v3372_v61 = vmax.f32 %v3309_v40, 1e-24 }
 0x322   : > { %v2597_v9 = vpop.eup %2596 }
 0x323   : > { %v957_v6 = vmul.f32 %v2597_v9, %v841_v32  ;;  %v921_v11 = vmul.f32 %v2595_v34, %v920_v2  ;;  %vm963_vm13 = vweird.f32 %v2597_v9  ;;  %v529_v32 = vmax.f32 %v3265_v5, 1e-24 }
 0x324   : > { %vm964_vm2 = vmor %vm962_vm14, %vm963_vm13  ;;  %v3376_v5 = vmax.f32 %v3268_v7, 1e-24  ;;  %vm942_vm15 = vweird.f32 %v3372_v61 }
 0x325   : > { %v958_v17 = vmul.f32 %v2597_v9, %v957_v6  ;;  %v925_v1 = vsel %vm924_vm11, %v2595_v34, %v921_v11  ;;  %2598 = vrsqrt.f32 %v529_v32  ;;  %vm578_vm6 = vweird.f32 %v529_v32 }
 0x326   : > { %v1013_v31 = vmul.f32 %v925_v1, %v3251_v59  ;;  %2600 = vrsqrt.f32 %v3363_v48  ;;  %vm608_vm11 = vweird.f32 %v3366_v50 }
 0x327   : > { %v959_v3 = vmul.f32 0.5, %v958_v17  ;;  %2602 = vrsqrt.f32 %v3366_v50 }
 0x328   : > { %1219 = vrot.lane.b32.xlu2 %v1013_v31, %s2931_s22  ;;  %2604 = vrsqrt.f32 %v3372_v61 }
 0x329   : > { %v960_v8 = vsub.f32 1.5, %v959_v3  ;;  %v1164_v63 = vpop.permute.xlu2 %1163  ;;  %2606 = vrsqrt.f32 %v3376_v5 }
 0x32a   : > { %2375 = vmatpush.xpose.msk.msra.mxu3 %vm477_vm1, %v1164_v63  ;;  %2608 = vrsqrt.f32 %v3379_v4 }
 0x32b   : > { %v961_v30 = vmul.f32 %v2597_v9, %v960_v8  ;;  %v2599_v37 = vpop.eup %2598  ;;  %2610 = vrsqrt.f32 %v3389_v47 }
 0x32c   : > { %v573_v55 = vmul.f32 %v2599_v37, %v529_v32  ;;  %v3382_v0 = vpop.eup %2600  ;;  %vm579_vm5 = vweird.f32 %v2599_v37 }
 0x32d   : > { %2376 = vmatmul.msk.f32.vlgmr.msra.gmra.mxu3 %vm477_vm1, %v707_v20  ;;  %v965_v53 = vsel %vm964_vm2, %v2597_v9, %v961_v30  ;;  %v3384_v24 = vpop.eup %2602  ;;  %v987_v7 = vmul.f32 %v3382_v0, %v3363_v48  ;;  %v3400_v9 = vmax.f32 %v3320_v35, 1e-24  ;;  %vm580_vm7 = vmor %vm578_vm6, %vm579_vm5  ;;  %vm993_vm8 = vweird.f32 %v3382_v0 }
 0x32e   : > { %2381 = vmatpush.xpose.msk.msrb.mxu3 %vm477_vm1, %v1248_v58  ;;  %v1017_v34 = vmul.f32 %v965_v53, %v3231_v52  ;;  %v574_v22 = vmul.f32 %v2599_v37, %v573_v55  ;;  %v603_v2 = vmul.f32 %v3384_v24, %v3366_v50  ;;  %v3397_v58 = vpop.eup %2604  ;;  %v3430_v55 = vmax.f32 %v3302_v18, 1e-24  ;;  %vm994_vm12 = vmor %vm992_vm10, %vm993_vm8 }
 0x32f   : > { %v3402_v6 = vpop.eup %2606  ;;  %v988_v21 = vmul.f32 %v3382_v0, %v987_v7  ;;  %v937_v57 = vmul.f32 %v3397_v58, %v3372_v61  ;;  %2612 = vrsqrt.f32 %v3400_v9  ;;  %vm609_vm9 = vweird.f32 %v3384_v24 }
 0x330   : > { %1331 = vrot.lane.b32.xlu0 %v1017_v34, %s2931_s22  ;;  %v575_v40 = vmul.f32 0.5, %v574_v22  ;;  %v3406_v13 = vpop.eup %2608  ;;  %v604_v15 = vmul.f32 %v3384_v24, %v603_v2  ;;  %v583_v17 = vmul.f32 %v3402_v6, %v3376_v5  ;;  %2614 = vrsqrt.f32 %v3430_v55  ;;  %vm3446_vm13 = vmor %vm608_vm11, %vm609_vm9 }
 0x331   : > { %v977_v35 = vmul.f32 %v3406_v13, %v3379_v4  ;;  %v989_v1 = vmul.f32 0.5, %v988_v21  ;;  %v938_v3 = vmul.f32 %v3397_v58, %v937_v57  ;;  %v3419_v8 = vpop.eup %2610  ;;  %vm943_vm14 = vweird.f32 %v3397_v58 }
 0x332   : > { %v576_v11 = vsub.f32 1.5, %v575_v40  ;;  %v605_v25 = vmul.f32 0.5, %v604_v15  ;;  %v584_v63 = vmul.f32 %v3402_v6, %v583_v17  ;;  %vm3463_vm2 = vmor %vm942_vm15, %vm943_vm14  ;;  %vm983_vm3 = vweird.f32 %v3406_v13 }
 0x333   : > { %v978_v20 = vmul.f32 %v3406_v13, %v977_v35  ;;  %v990_v30 = vsub.f32 1.5, %v989_v1  ;;  %v939_v34 = vmul.f32 0.5, %v938_v3  ;;  %v3458_v1 = vmax.f32 %v3281_v36, 1e-24 }
 0x334   : > { %v577_v31 = vmul.f32 %v2599_v37, %v576_v11  ;;  %v606_v38 = vsub.f32 1.5, %v605_v25  ;;  %v585_v32 = vmul.f32 0.5, %v584_v63  ;;  %vm589_vm4 = vweird.f32 %v3402_v6 }
 0x335   : > { %2382 = vmatmul.msk.f32.vlgmr.msrb.gmra.mxu3 %vm477_vm1, %v710_v49  ;;  %v3423_v53 = vpop.eup %2612  ;;  %v967_v49 = vmul.f32 %v3419_v8, %v3389_v47  ;;  %v979_v40 = vmul.f32 0.5, %v978_v20  ;;  %v991_v16 = vmul.f32 %v3382_v0, %v990_v30  ;;  %v940_v7 = vsub.f32 1.5, %v939_v34  ;;  %v3539_v30 = vld [vmem:[#allocation8] sm:$0xff] }
 0x336   : > { %v581_v29 = vsel %vm580_vm7, %v2599_v37, %v577_v31  ;;  %v997_v22 = vmul.f32 %v3423_v53, %v3400_v9  ;;  %v586_v2 = vsub.f32 1.5, %v585_v32  ;;  %v2615_v63 = vpop.eup %2614  ;;  %vm982_vm5 = vweird.f32 %v3379_v4 }
 0x337   : > { %v705_v37 = vmul.f32 %v581_v29, %v3155_v19  ;;  %v968_v18 = vmul.f32 %v3419_v8, %v967_v49  ;;  %v980_v57 = vsub.f32 1.5, %v979_v40  ;;  %v995_v15 = vsel %vm994_vm12, %v3382_v0, %v991_v16  ;;  %vm3482_vm7 = vmor %vm982_vm5, %vm983_vm3 }
 0x338   : > { %v998_v21 = vmul.f32 %v3423_v53, %v997_v22  ;;  %v941_v50 = vmul.f32 %v3397_v58, %v940_v7  ;;  %v1020_v31 = vmul.f32 %v995_v15, %v3229_v51  ;;  %vm588_vm6 = vweird.f32 %v3376_v5 }
 0x339   : > { %v969_v17 = vmul.f32 0.5, %v968_v18  ;;  %v981_v25 = vmul.f32 %v3406_v13, %v980_v57  ;;  %vm3486_vm8 = vmor %vm588_vm6, %vm589_vm4  ;;  %2616 = vrsqrt.f32 %v3458_v1  ;;  %v613_v29 = vmul.f32 %v2615_v63, %v3430_v55 }
 0x33a   : > { %v999_v3 = vmul.f32 0.5, %v998_v21  ;;  %v945_v61 = vsel %vm3463_vm2, %v3397_v58, %v941_v50  ;;  %vm973_vm9 = vweird.f32 %v3419_v8  ;;  %vm1002_vm10 = vweird.f32 %v3400_v9 }
 0x33b   : > { %v970_v36 = vsub.f32 1.5, %v969_v17  ;;  %v1015_v4 = vmul.f32 %v945_v61, %v3204_v39  ;;  %vm1003_vm11 = vweird.f32 %v3423_v53  ;;  %vm972_vm12 = vweird.f32 %v3389_v47 }
 0x33c   : > { %v1000_v58 = vsub.f32 1.5, %v999_v3  ;;  %vm1004_vm14 = vmor %vm1002_vm10, %vm1003_vm11  ;;  %vm619_vm15 = vweird.f32 %v2615_v63  ;;  %vm618_vm2 = vweird.f32 %v3430_v55  ;;  %v2536_v21 = vpack.i.bf16 %v3224_v46, %v3155_v19 }
 0x33d   : > { %v971_v34 = vmul.f32 %v3419_v8, %v970_v36  ;;  %vm620_vm3 = vmor %vm618_vm2, %vm619_vm15  ;;  %v537_v57 = vmax.f32 %v3324_v54, 1e-24  ;;  %vm648_vm5 = vweird.f32 %v3458_v1 }
 0x33e   : > { %v1001_v49 = vmul.f32 %v3423_v53, %v1000_v58 }
 0x33f   : > { %vm658_vm11 = vweird.f32 %v537_v57 }
 0x340   : > { %v1005_v32 = vsel %vm1004_vm14, %v3423_v53, %v1001_v49  ;;  %v535_v49 = vmax.f32 %v3294_v62, 1e-24 }
 0x341   : > { %v1021_v16 = vmul.f32 %v1005_v32, %v3242_v56 }
 0x346   : > { %515 = vadd.xlane.f32.xlu1 %v514_v60 }
 0x351   : > { %524 = vadd.xlane.f32.xlu2 %v523_v45  ;;  %v607_v45 = vmul.f32 %v3384_v24, %v606_v38 }
 0x353   : > { %v611_v48 = vsel %vm3446_vm13, %v3384_v24, %v607_v45  ;;  %vm974_vm13 = vmor %vm972_vm12, %vm973_vm9 }
 0x354   : > { %v708_v24 = vmul.f32 %v611_v48, %v3219_v44  ;;  %v3479_v44 = vmax.f32 %v3217_v43, 1e-24  ;;  %v985_v43 = vsel %vm3482_vm7, %v3406_v13, %v981_v25  ;;  %v975_v9 = vsel %vm974_vm13, %v3419_v8, %v971_v34 }
 0x355   : > { %v1019_v13 = vmul.f32 %v985_v43, %v3209_v41  ;;  %v1018_v47 = vmul.f32 %v975_v9, %v3169_v23  ;;  %v2531_v8 = vpack.i.bf16 %v3138_v12, %v3131_v10  ;;  %v3542_v43 = vld [vmem:[#allocation10] sm:$0xff]  ;;  %v540_v34 = vmax.f32 %v3298_v14, 1e-24 }
 0x356   : > { %2618 = vrsqrt.f32 %v3479_v44 }
 0x357   : > { %2620 = vrsqrt.f32 %v537_v57  ;;  %vm688_vm14 = vweird.f32 %v540_v34 }
 0x358   : > { %2622 = vrsqrt.f32 %v540_v34 }
 0x359   : > { %2624 = vrsqrt.f32 %v535_v49 }
 0x35a   : > { %518 = vadd.xlane.f32.xlu0 %v517_v27  ;;  %v587_v27 = vmul.f32 %v3402_v6, %v586_v2 }
 0x35c   : > { %v591_v5 = vsel %vm3486_vm8, %v3402_v6, %v587_v27  ;;  %vm558_vm8 = vweird.f32 %v3479_v44 }
 0x35d   : > { %v706_v6 = vmul.f32 %v591_v5, %v3178_v26 }
 0x35e   : > { %v1108_v60 = vpop.permute.xlu0 %1107 }
 0x35f   : > { %2371 = vmatpush.xpose.msk.msra.mxu1 %vm477_vm1, %v1108_v60  ;;  %2527 = vrot.lane.b32.xlu1 %v2526_v42, %s2932_s13  ;;  %v614_v42 = vmul.f32 %v2615_v63, %v613_v29  ;;  %v2617_v60 = vpop.eup %2616 }
 0x360   : > { %v2619_v40 = vpop.eup %2618  ;;  %vm649_vm4 = vweird.f32 %v2617_v60 }
 0x361   : > { %v615_v22 = vmul.f32 0.5, %v614_v42  ;;  %v553_v7 = vmul.f32 %v2619_v40, %v3479_v44  ;;  %vm650_vm6 = vmor %vm648_vm5, %vm649_vm4  ;;  %vm559_vm7 = vweird.f32 %v2619_v40  ;;  %v2621_v0 = vpop.eup %2620  ;;  %v1047_v44 = vpop.f32.mrf.mxu3 }
 0x362   : > { %2372 = vmatmul.msk.f32.vlgmr.msra.gmra.mxu1 %vm477_vm1, %v705_v37  ;;  %v643_v37 = vmul.f32 %v2617_v60, %v3458_v1  ;;  %vm560_vm9 = vmor %vm558_vm8, %vm559_vm7  ;;  %v653_v25 = vmul.f32 %v2621_v0, %v537_v57  ;;  %vm659_vm10 = vweird.f32 %v2621_v0  ;;  %v1474_v58 = vmul.f32 %v3539_v30, %v1047_v44 }
 0x363   : > { %v616_v18 = vsub.f32 1.5, %v615_v22  ;;  %v554_v2 = vmul.f32 %v2619_v40, %v553_v7  ;;  %vm660_vm12 = vmor %vm658_vm11, %vm659_vm10 }
 0x364   : > { %v644_v45 = vmul.f32 %v2617_v60, %v643_v37  ;;  %v654_v61 = vmul.f32 %v2621_v0, %v653_v25  ;;  %v3547_v29 = vadd.f32 %v3542_v43, %v1474_v58 }
 0x365   : > { %v617_v53 = vmul.f32 %v2615_v63, %v616_v18  ;;  %v555_v15 = vmul.f32 0.5, %v554_v2 }
 0x366   : > { %v1192_v35 = vpop.permute.xlu0 %1191  ;;  %v645_v11 = vmul.f32 0.5, %v644_v45  ;;  %v655_v27 = vmul.f32 0.5, %v654_v61  ;;  %v1510_v5 = vsel %vm477_vm1, %v3547_v29, -inf }
 0x367   : > { %2377 = vmatpush.xpose.msk.msrb.mxu1 %vm477_vm1, %v1192_v35  ;;  %v621_v17 = vsel %vm620_vm3, %v2615_v63, %v617_v53  ;;  %v556_v35 = vsub.f32 1.5, %v555_v15 }
 0x368   : > { %v646_v48 = vsub.f32 1.5, %v645_v11  ;;  %v709_v50 = vmul.f32 %v621_v17, %v3251_v59  ;;  %v656_v63 = vsub.f32 1.5, %v655_v27 }
 0x369   : > { %1415 = vrot.lane.b32.xlu2 %v1020_v31, %s2931_s22  ;;  %v557_v19 = vmul.f32 %v2619_v40, %v556_v35 }
 0x36a   : > { %2378 = vmatmul.msk.f32.vlgmr.msrb.gmra.mxu1 %vm477_vm1, %v708_v24  ;;  %v647_v31 = vmul.f32 %v2617_v60, %v646_v48  ;;  %v657_v20 = vmul.f32 %v2621_v0, %v656_v63 }
 0x36b   : > { %v561_v24 = vsel %vm560_vm9, %v2619_v40, %v557_v19 }
 0x36c   : > { %v651_v54 = vsel %vm650_vm6, %v2617_v60, %v647_v31  ;;  %v703_v1 = vmul.f32 %v561_v24, %v3138_v12  ;;  %vm638_vm6 = vweird.f32 %v535_v49 }
 0x36d   : > { %v712_v3 = vmul.f32 %v651_v54, %v3224_v46  ;;  %v661_v46 = vsel %vm660_vm12, %v2621_v0, %v657_v20 }
 0x36e   : > { %v1136_v38 = vpop.permute.xlu1 %1135  ;;  %1275 = vrot.lane.b32.xlu0 %v1015_v4, %s2931_s22  ;;  %v713_v12 = vmul.f32 %v661_v46, %v3231_v52 }
 0x36f   : > { %2373 = vmatpush.xpose.msk.msra.mxu2 %vm477_vm1, %v1136_v38  ;;  %v2623_v38 = vpop.eup %2622 }
 0x370   : > { %v3556_v22 = vpop.eup %2624  ;;  %vm689_vm13 = vweird.f32 %v2623_v38 }
 0x371   : > { %1387 = vrot.lane.b32.xlu2 %v1019_v13, %s2931_s22  ;;  %v683_v13 = vmul.f32 %v2623_v38, %v540_v34  ;;  %v633_v14 = vmul.f32 %v3556_v22, %v535_v49  ;;  %vm690_vm15 = vmor %vm688_vm14, %vm689_vm13  ;;  %vm639_vm4 = vweird.f32 %v3556_v22  ;;  %vm2154_vm14 = vcmask 130048  }
 0x372   : > { %2374 = vmatmul.msk.f32.vlgmr.msra.gmra.mxu2 %vm477_vm1, %v706_v6  ;;  %vm640_vm8 = vmor %vm638_vm6, %vm639_vm4 }
 0x373   : > { %v684_v6 = vmul.f32 %v2623_v38, %v683_v13  ;;  %v634_v18 = vmul.f32 %v3556_v22, %v633_v14 }
 0x375   : > { %v685_v42 = vmul.f32 0.5, %v684_v6  ;;  %v635_v15 = vmul.f32 0.5, %v634_v18 }
 0x376   : > { %1359 = vrot.lane.b32.xlu0 %v1018_v47, %s2931_s22 }
 0x377   : > { %v686_v9 = vsub.f32 1.5, %v685_v42  ;;  %v636_v19 = vsub.f32 1.5, %v635_v15  ;;  %v3587_v42 = vld [vmem:[#allocation8 + $0x8] sm:$0xff] }
 0x379   : > { %1443 = vrot.lane.b32.xlu2 %v1021_v16, %s2931_s22  ;;  %v687_v40 = vmul.f32 %v2623_v38, %v686_v9  ;;  %v637_v25 = vmul.f32 %v3556_v22, %v636_v19  ;;  %s2232_s22 = sshll.u32 %s2229_s18, 4  ;;  %s2233_s22 = int_to_ptr.hbm [resolvable:$true] %s2232_s22 }
 0x37b   : > { %v691_v62 = vsel %vm690_vm15, %v2623_v38, %v687_v40  ;;  %v641_v44 = vsel %vm640_vm8, %v3556_v22, %v637_v25  ;;  %v3592_v22 = vld [vmem:[#allocation10 + $0x8] sm:$0xff]  ;;  %vm2159_vm15 = vcmask 195584  }
 0x37c   : > { %v711_v34 = vmul.f32 %v641_v44, %v3204_v39  ;;  %v1473_v44 = vld [vmem:[#allocation8 + $0x18] sm:$0xff] }
 0x37e   : > { %2532 = vrot.lane.b32.xlu0 %v2531_v8, %s2932_s13  ;;  %v716_v8 = vmul.f32 %v691_v62, %v3229_v51 }
 0x381   : > { %2537 = vrot.lane.b32.xlu2 %v2536_v21, %s2932_s13 }
 0x382   : > { %v1220_v10 = vpop.permute.xlu2 %1219 }
 0x383   : > { %2379 = vmatpush.xpose.msk.msrb.mxu2 %vm477_vm1, %v1220_v10 }
 0x386   : > { %v1304_v55 = vpop.permute.xlu1 %1303  ;;  %2380 = vmatmul.msk.f32.vlgmr.msrb.gmra.mxu2 %vm477_vm1, %v709_v50 }
 0x387   : > { %2385 = vmatpush.xpose.msk.msra.mxu2 %vm477_vm1, %v1304_v55 }
 0x38e   : > { %v1052_v36 = vpop.permute.xlu1 %1051  ;;  %2386 = vmatmul.msk.f32.vlgmr.msra.gmra.mxu2 %vm477_vm1, %v712_v3 }
 0x38f   : > { %2367 = vmatpush.xpose.msk.msrb.mxu0 %vm477_vm1, %v1052_v36 }
 0x392   : > { %2368 = vmatmul.msk.f32.vlgmr.msrb.gmra.mxu0 %vm477_vm1, %v703_v1 }
 0x3a2   : > { %v1332_v4 = vpop.permute.xlu0 %1331 }
 0x3a3   : > { %2387 = vmatpush.xpose.msk.msra.mxu3 %vm477_vm1, %v1332_v4 }
 0x3a6   : > { %2388 = vmatmul.msk.f32.vlgmr.msra.gmra.mxu3 %vm477_vm1, %v713_v12 }
 0x3aa   : > { %1511 = vmax.xlane.f32.xlu2 %v1510_v5 }
 0x3b9   : > { %v516_v60 = vpop.xlane.xlu1 %515 }
 0x3ba   : > { %v3554_v37 = vmax.f32 %v516_v60, 1e-24 }
 0x3bc   : > { %vm668_vm12 = vweird.f32 %v3554_v37 }
 0x3c4   : > { %v525_v47 = vpop.xlane.xlu2 %524 }
 0x3c5   : > { %v541_v32 = vmax.f32 %v525_v47, 1e-24 }
 0x3c7   : > { %2626 = vrsqrt.f32 %v541_v32  ;;  %vm698_vm3 = vweird.f32 %v541_v32 }
 0x3c8   : > { %2628 = vrsqrt.f32 %v3554_v37 }
 0x3cc   : > { %v1416_v16 = vpop.permute.xlu2 %1415 }
 0x3cd   : > { %v2627_v7 = vpop.eup %2626  ;;  %v519_v45 = vpop.xlane.xlu0 %518  ;;  %2393 = vmatpush.xpose.msk.msrb.mxu3 %vm477_vm1, %v1416_v16 }
 0x3ce   : > { %v693_v2 = vmul.f32 %v2627_v7, %v541_v32  ;;  %v539_v11 = vmax.f32 %v519_v45, 1e-24  ;;  %v3563_v53 = vpop.eup %2628  ;;  %vm699_vm2 = vweird.f32 %v2627_v7 }
 0x3cf   : > { %v663_v50 = vmul.f32 %v3563_v53, %v3554_v37  ;;  %vm700_vm5 = vmor %vm698_vm3, %vm699_vm2  ;;  %vm669_vm11 = vweird.f32 %v3563_v53 }
 0x3d0   : > { %v694_v21 = vmul.f32 %v2627_v7, %v693_v2  ;;  %2630 = vrsqrt.f32 %v539_v11  ;;  %2394 = vmatmul.msk.f32.vlgmr.msrb.gmra.mxu3 %vm477_vm1, %v716_v8  ;;  %vm678_vm9 = vweird.f32 %v539_v11  ;;  %vm670_vm13 = vmor %vm668_vm12, %vm669_vm11  ;;  %v1103_v8 = vpop.f32.mrf.mxu3 }
 0x3d1   : > { %v2528_v57 = vpop.permute.xlu1 %2527  ;;  %v664_v54 = vmul.f32 %v3563_v53, %v663_v50 }
 0x3d2   : > { %v695_v48 = vmul.f32 0.5, %v694_v21  ;;  %v2530_v17 = vunpack.i.h.bf16 %v2528_v57  ;;  %v2529_v10 = vunpack.i.l.bf16 %v2528_v57 }
 0x3d3   : > { %v665_v36 = vmul.f32 0.5, %v664_v54  ;;  %v1472_v54 = vld [vmem:[#allocation8 + $0x10] sm:$0xff] }
 0x3d4   : > { %v696_v35 = vsub.f32 1.5, %v695_v48  ;;  %1759 = vmatpush.msra.mxu3 %v2529_v10  ;;  %v1388_v31 = vpop.permute.xlu2 %1387 }
 0x3d5   : > { %2391 = vmatpush.xpose.msk.msrb.mxu2 %vm477_vm1, %v1388_v31  ;;  %v666_v46 = vsub.f32 1.5, %v665_v36 }
 0x3d6   : > { %1863 = vmatpush.msrb.mxu3 %v2530_v17  ;;  %v2631_v55 = vpop.eup %2630  ;;  %v697_v0 = vmul.f32 %v2627_v7, %v696_v35 }
 0x3d7   : > { %v673_v3 = vmul.f32 %v2631_v55, %v539_v11  ;;  %vm679_vm7 = vweird.f32 %v2631_v55  ;;  %v667_v13 = vmul.f32 %v3563_v53, %v666_v46  ;;  %v1476_v11 = vmul.f32 %v3539_v30, %v1103_v8 }
 0x3d8   : > { %v701_v1 = vsel %vm700_vm5, %v2627_v7, %v697_v0  ;;  %vm680_vm10 = vmor %vm678_vm9, %vm679_vm7  ;;  %v1187_v57 = vpop.f32.mrf.mxu3 }
 0x3d9   : > { %v674_v24 = vmul.f32 %v2631_v55, %v673_v3  ;;  %v717_v20 = vmul.f32 %v701_v1, %v3242_v56  ;;  %v671_v9 = vsel %vm670_vm13, %v3563_v53, %v667_v13  ;;  %v3609_v21 = vadd.f32 %v3542_v43, %v1476_v11 }
 0x3da   : > { %v714_v40 = vmul.f32 %v671_v9, %v3169_v23  ;;  %v1479_v25 = vmul.f32 %v3587_v42, %v1187_v57 }
 0x3db   : > { %v675_v61 = vmul.f32 0.5, %v674_v24  ;;  %v1516_v48 = vsel %vm477_vm1, %v3609_v21, -inf  ;;  %v1492_v24 = vld [vmem:[#allocation10 + $0x10] sm:$0xff] }
 0x3dc   : > { %v1444_v27 = vpop.permute.xlu2 %1443 }
 0x3dd   : > { %v676_v63 = vsub.f32 1.5, %v675_v61  ;;  %2395 = vmatpush.xpose.msk.msra.mxu0 %vm477_vm1, %v1444_v27  ;;  %v3634_v61 = vadd.f32 %v3592_v22, %v1479_v25 }
 0x3df   : > { %v677_v58 = vmul.f32 %v2631_v55, %v676_v63  ;;  %v1131_v4 = vpop.f32.mrf.mxu1  ;;  %v1525_v63 = vsel %vm477_vm1, %v3634_v61, -inf }
 0x3e0   : > { %v1276_v12 = vpop.permute.xlu0 %1275  ;;  %2396 = vmatmul.msk.f32.vlgmr.msra.gmra.mxu0 %vm477_vm1, %v717_v20  ;;  %v1477_v15 = vmul.f32 %v3539_v30, %v1131_v4 }
 0x3e1   : > { %v681_v5 = vsel %vm680_vm10, %v2631_v55, %v677_v58  ;;  %2383 = vmatpush.xpose.msk.msra.mxu1 %vm477_vm1, %v1276_v12 }
 0x3e2   : > { %v715_v38 = vmul.f32 %v681_v5, %v3209_v41  ;;  %v3616_v35 = vadd.f32 %v3542_v43, %v1477_v15  ;;  %v1493_v5 = vld [vmem:[#allocation10 + $0x18] sm:$0xff] }
 0x3e4   : > { %2384 = vmatmul.msk.f32.vlgmr.msra.gmra.mxu1 %vm477_vm1, %v711_v34  ;;  %2392 = vmatmul.msk.f32.vlgmr.msrb.gmra.mxu2 %vm477_vm1, %v715_v38  ;;  %v3583_v6 = vpop.permute.xlu2 %2537  ;;  %v1519_v19 = vsel %vm477_vm1, %v3616_v35, -inf }
 0x3e5   : > { %v2539_v49 = vunpack.i.l.bf16 %v3583_v6 }
 0x3e7   : > { %v1215_v60 = vpop.f32.mrf.mxu1  ;;  %1785 = vmatpush.msrb.mxu0 %v2539_v49 }
 0x3e8   : > { %v1480_v47 = vmul.f32 %v3587_v42, %v1215_v60  ;;  %v1360_v32 = vpop.permute.xlu0 %1359 }
 0x3e9   : > { %2389 = vmatpush.xpose.msk.msrb.mxu1 %vm477_vm1, %v1360_v32 }
 0x3ea   : > { %v3596_v37 = vadd.f32 %v3592_v22, %v1480_v47 }
 0x3ec   : > { %2390 = vmatmul.msk.f32.vlgmr.msrb.gmra.mxu1 %vm477_vm1, %v714_v40  ;;  %v1528_v14 = vsel %vm477_vm1, %v3596_v37, -inf }
 0x3ed   : > { %1529 = vmax.xlane.f32.xlu0 %v1528_v14 }
 0x3f0   : > { %v2533_v62 = vpop.permute.xlu0 %2532 }
 0x3f1   : > { %v2535_v16 = vunpack.i.h.bf16 %v2533_v62  ;;  %v2534_v7 = vunpack.i.l.bf16 %v2533_v62 }
 0x3f3   : > { %1707 = vmatpush.msra.mxu1 %v2534_v7  ;;  %1733 = vmatpush.msra.mxu2 %v2535_v16 }
 0x3f5   : > { %v1159_v31 = vpop.f32.mrf.mxu2 }
 0x3f6   : > { %v1478_v55 = vmul.f32 %v3587_v42, %v1159_v31 }
 0x3f8   : > { %v3624_v3 = vadd.f32 %v3592_v22, %v1478_v55  ;;  %v2541_v55 = vpack.i.bf16 %v3194_v33, %v3178_v26 }
 0x3fa   : > { %v1522_v36 = vsel %vm477_vm1, %v3624_v3, -inf }
 0x409   : > { %v1243_v20 = vpop.f32.mrf.mxu2 }
 0x40a   : > { %v1481_v26 = vmul.f32 %v3587_v42, %v1243_v20 }
 0x40f   : > { %v1075_v45 = vpop.f32.mrf.mxu0 }
 0x410   : > { %v1475_v18 = vmul.f32 %v3539_v30, %v1075_v45  ;;  %v1271_v30 = vpop.f32.mrf.mxu3 }
 0x411   : > { %v1327_v4 = vpop.f32.mrf.mxu2 }
 0x412   : > { %v3603_v2 = vadd.f32 %v3542_v43, %v1475_v18  ;;  %v1484_v40 = vmul.f32 %v1472_v54, %v1327_v4 }
 0x414   : > { %v1513_v53 = vsel %vm477_vm1, %v3603_v2, -inf  ;;  %v3654_v18 = vadd.f32 %v1492_v24, %v1484_v40 }
 0x415   : > { %1514 = vmax.xlane.f32.xlu1 %v1513_v53 }
 0x416   : > { %v1540_v53 = vsel %vm477_vm1, %v3654_v18, -inf }
 0x41d   : > { %1517 = vmax.xlane.f32.xlu1 %v1516_v48  ;;  %v1512_v17 = vpop.xlane.xlu2 %1511 }
 0x41e   : > { %v1558_v10 = vsub.f32 %v3547_v29, %v1512_v17  ;;  %v1482_v29 = vmul.f32 %v1472_v54, %v1271_v30 }
 0x420   : > { %v1574_v50 = vmul.f32 1.442695, %v1558_v10  ;;  %v3631_v1 = vadd.f32 %v1492_v24, %v1482_v29 }
 0x422   : > { %2632 = vpow2.f32 %v1574_v50  ;;  %v1534_v27 = vsel %vm477_vm1, %v3631_v1, -inf }
 0x425   : > { %1520 = vmax.xlane.f32.xlu1 %v1519_v19 }
 0x428   : > { %v3621_v0 = vpop.eup %2632 }
 0x429   : > { %v1606_v43 = vsel %vm477_vm1, %v3621_v0, 0.0  ;;  %v1355_v12 = vpop.f32.mrf.mxu3 }
 0x42a   : > { %1607 = vadd.xlane.f32.xlu2 %v1606_v43  ;;  %v1485_v13 = vmul.f32 %v1472_v54, %v1355_v12 }
 0x42c   : > { %v3644_v9 = vadd.f32 %v1492_v24, %v1485_v13 }
 0x42d   : > { %1523 = vmax.xlane.f32.xlu1 %v1522_v36 }
 0x42e   : > { %v1543_v62 = vsel %vm477_vm1, %v3644_v9, -inf }
 0x432   : > { %1535 = vmax.xlane.f32.xlu2 %v1534_v27 }
 0x435   : > { %1526 = vmax.xlane.f32.xlu1 %v1525_v63 }
 0x453   : > { %v1439_v8 = vpop.f32.mrf.mxu3 }
 0x454   : > { %v1488_v11 = vmul.f32 %v1473_v44, %v1439_v8 }
 0x456   : > { %v3658_v57 = vadd.f32 %v1493_v5, %v1488_v11 }
 0x458   : > { %v1552_v15 = vsel %vm477_vm1, %v3658_v57, -inf }
 0x45d   : > { %v1467_v46 = vpop.f32.mrf.mxu0 }
 0x45e   : > { %v1489_v58 = vmul.f32 %v1473_v44, %v1467_v46 }
 0x460   : > { %v3640_v34 = vadd.f32 %v1493_v5, %v1489_v58  ;;  %v2546_v58 = vpack.i.bf16 %v3229_v51, %v3251_v59 }
 0x461   : > { %v1299_v38 = vpop.f32.mrf.mxu1 }
 0x462   : > { %v1555_v49 = vsel %vm477_vm1, %v3640_v34, -inf  ;;  %v1483_v29 = vmul.f32 %v1472_v54, %v1299_v38 }
 0x463   : > { %1556 = vmax.xlane.f32.xlu1 %v1555_v49 }
 0x464   : > { %v3671_v25 = vadd.f32 %v1492_v24, %v1483_v29  ;;  %v3682_v24 = vadd.f32 %v3592_v22, %v1481_v26  ;;  %v2551_v22 = vpack.i.bf16 %v3204_v39, %v3183_v28 }
 0x466   : > { %v1537_v33 = vsel %vm477_vm1, %v3671_v25, -inf  ;;  %v1531_v42 = vsel %vm477_vm1, %v3682_v24, -inf }
 0x467   : > { %v1411_v60 = vpop.f32.mrf.mxu2 }
 0x468   : > { %v1487_v47 = vmul.f32 %v1473_v44, %v1411_v60 }
 0x469   : > { %v1383_v32 = vpop.f32.mrf.mxu1 }
 0x46a   : > { %v1486_v14 = vmul.f32 %v1473_v44, %v1383_v32  ;;  %v3648_v16 = vadd.f32 %v1493_v5, %v1487_v47 }
 0x46b   : > { %1544 = vmax.xlane.f32.xlu1 %v1543_v62 }
 0x46c   : > { %v3650_v7 = vadd.f32 %v1493_v5, %v1486_v14  ;;  %v1530_v5 = vpop.xlane.xlu0 %1529  ;;  %v1549_v28 = vsel %vm477_vm1, %v3648_v16, -inf }
 0x46d   : > { %v1564_v13 = vsub.f32 %v3596_v37, %v1530_v5 }
 0x46e   : > { %v1546_v45 = vsel %vm477_vm1, %v3650_v7, -inf }
 0x46f   : > { %1547 = vmax.xlane.f32.xlu2 %v1546_v45  ;;  %v1586_v60 = vmul.f32 1.442695, %v1564_v13 }
 0x473   : > { %1541 = vmax.xlane.f32.xlu1 %v1540_v53 }
 0x47b   : > { %1553 = vmax.xlane.f32.xlu1 %v1552_v15 }
 0x488   : > { %v1515_v48 = vpop.xlane.xlu1 %1514 }
 0x489   : > { %v1559_v17 = vsub.f32 %v3603_v2, %v1515_v48 }
 0x48b   : > { %v1576_v10 = vmul.f32 1.442695, %v1559_v17 }
 0x48d   : > { %2634 = vpow2.f32 %v1576_v10 }
 0x490   : > { %v1518_v50 = vpop.xlane.xlu1 %1517 }
 0x491   : > { %v1560_v31 = vsub.f32 %v3609_v21, %v1518_v50 }
 0x493   : > { %v3666_v19 = vpop.eup %2634  ;;  %v1578_v30 = vmul.f32 1.442695, %v1560_v31 }
 0x494   : > { %2542 = vrot.lane.b32.xlu1 %v2541_v55, %s2932_s13  ;;  %v1609_v43 = vsel %vm477_vm1, %v3666_v19, 0.0 }
 0x495   : > { %2636 = vpow2.f32 %v1578_v30  ;;  %1610 = vadd.xlane.f32.xlu0 %v1609_v43 }
 0x498   : > { %v1521_v2 = vpop.xlane.xlu1 %1520 }
 0x499   : > { %v1561_v36 = vsub.f32 %v3616_v35, %v1521_v2 }
 0x49b   : > { %v3674_v21 = vpop.eup %2636  ;;  %v1580_v27 = vmul.f32 1.442695, %v1561_v36 }
 0x49c   : > { %v1612_v54 = vsel %vm477_vm1, %v3674_v21, 0.0 }
 0x49d   : > { %2638 = vpow2.f32 %v1580_v27  ;;  %1538 = vmax.xlane.f32.xlu0 %v1537_v33  ;;  %1613 = vadd.xlane.f32.xlu2 %v1612_v54  ;;  %v1608_v63 = vpop.xlane.xlu2 %1607 }
 0x49e   : > { %2640 = vrcp.f32 %v1608_v63 }
 0x4a0   : > { %v1524_v4 = vpop.xlane.xlu1 %1523 }
 0x4a1   : > { %v1562_v12 = vsub.f32 %v3624_v3, %v1524_v4  ;;  %v2540_v4 = vunpack.i.h.bf16 %v3583_v6 }
 0x4a3   : > { %v3684_v35 = vpop.eup %2638  ;;  %v1582_v38 = vmul.f32 1.442695, %v1562_v12 }
 0x4a4   : > { %v2641_v44 = vpop.eup %2640  ;;  %v1615_v20 = vsel %vm477_vm1, %v3684_v35, 0.0 }
 0x4a5   : > { %v1670_v46 = vmul.f32 %v2641_v44, %v3621_v0  ;;  %1532 = vmax.xlane.f32.xlu0 %v1531_v42  ;;  %1616 = vadd.xlane.f32.xlu2 %v1615_v20  ;;  %2642 = vpow2.f32 %v1582_v38  ;;  %v1536_v47 = vpop.xlane.xlu2 %1535 }
 0x4a6   : > { %2644 = vpow2.f32 %v1586_v60  ;;  %v1566_v39 = vsub.f32 %v3631_v1, %v1536_v47 }
 0x4a7   : > { %2397 = vmatmul.msk.f32.vlgmr.msra.gmra.mxu1 %vm477_vm1, %v1670_v46 }
 0x4a8   : > { %v1527_v0 = vpop.xlane.xlu1 %1526 }
 0x4a9   : > { %v1563_v49 = vsub.f32 %v3634_v61, %v1527_v0  ;;  %v1590_v61 = vmul.f32 1.442695, %v1566_v39 }
 0x4ab   : > { %v1584_v51 = vmul.f32 1.442695, %v1563_v49  ;;  %v3701_v32 = vpop.eup %2642 }
 0x4ac   : > { %v1618_v37 = vsel %vm477_vm1, %v3701_v32, 0.0  ;;  %v3708_v3 = vpop.eup %2644 }
 0x4ad   : > { %2646 = vpow2.f32 %v1584_v51  ;;  %v1624_v45 = vsel %vm477_vm1, %v3708_v3, 0.0 }
 0x4ae   : > { %2648 = vpow2.f32 %v1590_v61 }
 0x4b3   : > { %v3710_v14 = vpop.eup %2646 }
 0x4b4   : > { %v1621_v1 = vsel %vm477_vm1, %v3710_v14, 0.0  ;;  %v3717_v53 = vpop.eup %2648 }
 0x4b5   : > { %v1630_v17 = vsel %vm477_vm1, %v3717_v53, 0.0 }
 0x4b9   : > { %2547 = vrot.lane.b32.xlu0 %v2546_v58, %s2932_s13 }
 0x4bd   : > { %2552 = vrot.lane.b32.xlu2 %v2551_v22, %s2932_s13 }
 0x4d6   : > { %v1557_v59 = vpop.xlane.xlu1 %1556 }
 0x4d7   : > { %v1573_v15 = vsub.f32 %v3640_v34, %v1557_v59 }
 0x4d9   : > { %v1604_v10 = vmul.f32 1.442695, %v1573_v15 }
 0x4de   : > { %v1545_v62 = vpop.xlane.xlu1 %1544 }
 0x4e2   : > { %v1548_v40 = vpop.xlane.xlu2 %1547 }
 0x4e3   : > { %1550 = vmax.xlane.f32.xlu0 %v1549_v28  ;;  %v1570_v8 = vsub.f32 %v3650_v7, %v1548_v40  ;;  %v2556_v40 = vpack.i.bf16 %v3169_v23, %v3231_v52 }
 0x4e5   : > { %v1598_v11 = vmul.f32 1.442695, %v1570_v8 }
 0x4e6   : > { %1619 = vadd.xlane.f32.xlu2 %v1618_v37  ;;  %v1542_v48 = vpop.xlane.xlu1 %1541 }
 0x4e7   : > { %2650 = vpow2.f32 %v1598_v11  ;;  %v1568_v63 = vsub.f32 %v3654_v18, %v1542_v48 }
 0x4e8   : > { %2652 = vpow2.f32 %v1604_v10 }
 0x4e9   : > { %v1594_v20 = vmul.f32 1.442695, %v1568_v63 }
 0x4eb   : > { %1625 = vadd.xlane.f32.xlu0 %v1624_v45 }
 0x4ed   : > { %v3722_v50 = vpop.eup %2650 }
 0x4ee   : > { %1622 = vadd.xlane.f32.xlu2 %v1621_v1  ;;  %v1642_v7 = vsel %vm477_vm1, %v3722_v50, 0.0  ;;  %v1554_v31 = vpop.xlane.xlu1 %1553  ;;  %v3726_v55 = vpop.eup %2652 }
 0x4ef   : > { %v1651_v34 = vsel %vm477_vm1, %v3726_v55, 0.0  ;;  %v1572_v18 = vsub.f32 %v3658_v57, %v1554_v31 }
 0x4f6   : > { %1631 = vadd.xlane.f32.xlu2 %v1630_v17 }
 0x4fe   : > { %1643 = vadd.xlane.f32.xlu2 %v1642_v7 }
 0x506   : > { %v2543_v30 = vpop.permute.xlu1 %2542  ;;  %1652 = vadd.xlane.f32.xlu2 %v1651_v34 }
 0x507   : > { %v2545_v29 = vunpack.i.h.bf16 %v2543_v30  ;;  %v2544_v43 = vunpack.i.l.bf16 %v2543_v30 }
 0x508   : > { %v1611_v2 = vpop.xlane.xlu0 %1610 }
 0x509   : > { %2654 = vrcp.f32 %v1611_v2  ;;  %1811 = vmatpush.msrb.mxu1 %v2544_v43  ;;  %1837 = vmatpush.msrb.mxu2 %v2545_v29  ;;  %v2561_v43 = vpack.i.bf16 %v3242_v56, %v3209_v41 }
 0x50f   : > { %v2655_v36 = vpop.eup %2654 }
 0x510   : > { %v1671_v27 = vmul.f32 %v2655_v36, %v3666_v19  ;;  %v1539_v26 = vpop.xlane.xlu0 %1538  ;;  %v1614_v33 = vpop.xlane.xlu2 %1613 }
 0x511   : > { %v1567_v54 = vsub.f32 %v3671_v25, %v1539_v26  ;;  %2656 = vrcp.f32 %v1614_v33  ;;  %v1569_v25 = vsub.f32 %v3644_v9, %v1545_v62 }
 0x512   : > { %2398 = vmatmul.msk.f32.vlgmr.msra.gmra.mxu2 %vm477_vm1, %v1671_v27 }
 0x513   : > { %v1592_v44 = vmul.f32 1.442695, %v1567_v54  ;;  %v1596_v6 = vmul.f32 1.442695, %v1569_v25 }
 0x515   : > { %2658 = vpow2.f32 %v1592_v44 }
 0x517   : > { %v2657_v42 = vpop.eup %2656 }
 0x518   : > { %v1672_v46 = vmul.f32 %v2657_v42, %v3674_v21  ;;  %v1533_v58 = vpop.xlane.xlu0 %1532  ;;  %v1617_v22 = vpop.xlane.xlu2 %1616 }
 0x519   : > { %v1565_v19 = vsub.f32 %v3682_v24, %v1533_v58  ;;  %2660 = vrcp.f32 %v1617_v22  ;;  %v1602_v24 = vmul.f32 1.442695, %v1572_v18 }
 0x51a   : > { %2399 = vmatmul.msk.f32.vlgmr.msra.gmra.mxu3 %vm477_vm1, %v1672_v46  ;;  %2662 = vpow2.f32 %v1594_v20 }
 0x51b   : > { %v3739_v12 = vpop.eup %2658  ;;  %v1588_v5 = vmul.f32 1.442695, %v1565_v19  ;;  %1967 = vmatpush.msra.mxu3 %v2540_v4 }
 0x51c   : > { %v1633_v21 = vsel %vm477_vm1, %v3739_v12, 0.0 }
 0x51d   : > { %2664 = vpow2.f32 %v1588_v5  ;;  %1634 = vadd.xlane.f32.xlu0 %v1633_v21 }
 0x51e   : > { %2666 = vpow2.f32 %v1596_v6 }
 0x51f   : > { %v2661_v38 = vpop.eup %2660  ;;  %2668 = vpow2.f32 %v1602_v24 }
 0x520   : > { %v1673_v0 = vmul.f32 %v2661_v38, %v3684_v35  ;;  %v2553_v9 = vpop.permute.xlu2 %2552  ;;  %v3745_v13 = vpop.eup %2662 }
 0x521   : > { %v2555_v49 = vunpack.i.h.bf16 %v2553_v9  ;;  %v2554_v60 = vunpack.i.l.bf16 %v2553_v9  ;;  %v1636_v59 = vsel %vm477_vm1, %v3745_v13, 0.0 }
 0x522   : > { %2400 = vmatmul.msk.f32.vlgmr.msrb.gmra.mxu0 %vm477_vm1, %v1673_v0 }
 0x523   : > { %v3748_v57 = vpop.eup %2664  ;;  %1915 = vmatpush.msra.mxu1 %v2554_v60  ;;  %1941 = vmatpush.msra.mxu2 %v2555_v49 }
 0x524   : > { %v1627_v51 = vsel %vm477_vm1, %v3748_v57, 0.0  ;;  %v3754_v35 = vpop.eup %2666 }
 0x525   : > { %1628 = vadd.xlane.f32.xlu1 %v1627_v51  ;;  %1637 = vadd.xlane.f32.xlu0 %v1636_v59  ;;  %v2669_v47 = vpop.eup %2668  ;;  %v1639_v37 = vsel %vm477_vm1, %v3754_v35, 0.0 }
 0x526   : > { %v1648_v61 = vsel %vm477_vm1, %v2669_v47, 0.0 }
 0x52b   : > { %v2548_v28 = vpop.permute.xlu0 %2547 }
 0x52c   : > { %v2549_v39 = vunpack.i.l.bf16 %v2548_v28  ;;  %v2550_v7 = vunpack.i.h.bf16 %v2548_v28 }
 0x52d   : > { %1640 = vadd.xlane.f32.xlu1 %v1639_v37  ;;  %1649 = vadd.xlane.f32.xlu0 %v1648_v61 }
 0x52e   : > { %1889 = vmatpush.msra.mxu0 %v2549_v39 }
 0x546   : > { %2557 = vrot.lane.b32.xlu1 %v2556_v40, %s2932_s13 }
 0x556   : > { %v1551_v62 = vpop.xlane.xlu0 %1550 }
 0x557   : > { %v1571_v45 = vsub.f32 %v3648_v16, %v1551_v62 }
 0x559   : > { %v1600_v8 = vmul.f32 1.442695, %v1571_v45  ;;  %v1620_v1 = vpop.xlane.xlu2 %1619  ;;  %v2167_v45 = vld [vmem:[#allocation7 + $0x18] sm:$0xff] }
 0x55a   : > { %2670 = vrcp.f32 %v1620_v1  ;;  %v2165_v1 = vld [vmem:[#allocation7 + $0x8] sm:$0xff] }
 0x55b   : > { %2672 = vpow2.f32 %v1600_v8  ;;  %v2166_v8 = vld [vmem:[#allocation7 + $0x10] sm:$0xff] }
 0x55e   : > { %v1626_v11 = vpop.xlane.xlu0 %1625 }
 0x55f   : > { %2674 = vrcp.f32 %v1626_v11  ;;  %v2164_v11 = vld [vmem:[#allocation7] sm:$0xff] }
 0x560   : > { %v2671_v15 = vpop.eup %2670 }
 0x561   : > { %v3763_v48 = vpop.eup %2672  ;;  %v1674_v17 = vmul.f32 %v2671_v15, %v3701_v32  ;;  %v1623_v10 = vpop.xlane.xlu2 %1622 }
 0x562   : > { %2676 = vrcp.f32 %v1623_v10  ;;  %v1645_v23 = vsel %vm477_vm1, %v3763_v48, 0.0 }
 0x563   : > { %1646 = vadd.xlane.f32.xlu0 %v1645_v23  ;;  %2401 = vmatmul.msk.f32.vlgmr.msrb.gmra.mxu1 %vm477_vm1, %v1674_v17 }
 0x565   : > { %v2675_v52 = vpop.eup %2674 }
 0x566   : > { %v1676_v16 = vmul.f32 %v2675_v52, %v3708_v3 }
 0x568   : > { %v2677_v31 = vpop.eup %2676  ;;  %2403 = vmatmul.msk.f32.vlgmr.msrb.gmra.mxu3 %vm477_vm1, %v1676_v16 }
 0x569   : > { %v1675_v34 = vmul.f32 %v2677_v31, %v3710_v14  ;;  %2071 = vmatpush.msrb.mxu3 %v2550_v7  ;;  %v1632_v30 = vpop.xlane.xlu2 %1631 }
 0x56a   : > { %2678 = vrcp.f32 %v1632_v30 }
 0x56b   : > { %2402 = vmatmul.msk.f32.vlgmr.msrb.gmra.mxu2 %vm477_vm1, %v1675_v34 }
 0x570   : > { %v2679_v32 = vpop.eup %2678 }
 0x571   : > { %v1678_v29 = vmul.f32 %v2679_v32, %v3717_v53  ;;  %v1644_v44 = vpop.xlane.xlu2 %1643 }
 0x573   : > { %2405 = vmatmul.msk.f32.vlgmr.msra.gmra.mxu1 %vm477_vm1, %v1678_v29 }
 0x577   : > { %2562 = vrot.lane.b32.xlu0 %v2561_v43, %s2932_s13  ;;  %s2860_s13 = sshra.s32 %s2233_s22, 4  ;;  %s2861_s13 = int_to_ptr.hbm [resolvable:$true] %s2860_s13 }
 0x578   : > { %s2862_s28 = scalar_lea.hbm %s2861_s13, 32  ;;  %p2867_p11 = scmp.lt.s32.totalorder %s2861_s13, %s3866_s7 }
 0x579   : > { %v1653_v5 = vpop.xlane.xlu2 %1652  ;;  %p2863_p1 = scmp.ne.s32.totalorder %s2861_s13, %s2862_s28  ;;  %p2868_p2 = scmp.lt.s32.totalorder %s2866_s17, %s2862_s28 }
 0x57b   : > { %p2864_p4 = pnand %p2863_p1, %p3073_p3  ;;  %p2869_p9 = por %p2868_p2, %p2867_p11 }
 0x57d   : > { %p2865_p8 = pneg %p2864_p4 }
 0x57f   : > { %p2870_p10 = pnand %p2869_p9, %p2865_p8 }
 0x590   : > { %v1635_v3 = vpop.xlane.xlu0 %1634 }
 0x591   : > { %2680 = vrcp.f32 %v1635_v3 }
 0x597   : > { %v2681_v2 = vpop.eup %2680 }
 0x598   : > { %v1679_v14 = vmul.f32 %v2681_v2, %v3739_v12  ;;  %v1638_v36 = vpop.xlane.xlu0 %1637  ;;  %v1629_v27 = vpop.xlane.xlu1 %1628 }
 0x599   : > { %2682 = vrcp.f32 %v1638_v36  ;;  %v3789_v12 = vpop.f32.mrf.mxu1 }
 0x59a   : > { %2684 = vrcp.f32 %v1629_v27  ;;  %2406 = vmatmul.msk.f32.vlgmr.msra.gmra.mxu2 %vm477_vm1, %v1679_v14 }
 0x59d   : > { %v1761_v6 = vpop.f32.mrf.mxu3 }
 0x59f   : > { %v2683_v26 = vpop.eup %2682 }
 0x5a0   : > { %v2685_v53 = vpop.eup %2684  ;;  %v1680_v33 = vmul.f32 %v2683_v26, %v3745_v13  ;;  %v1650_v54 = vpop.xlane.xlu0 %1649 }
 0x5a1   : > { %v1677_v41 = vmul.f32 %v2685_v53, %v3748_v57  ;;  %2686 = vrcp.f32 %v1650_v54  ;;  %v1641_v42 = vpop.xlane.xlu1 %1640  ;;  %v1787_v57 = vpop.f32.mrf.mxu0 }
 0x5a2   : > { %2407 = vmatmul.msk.f32.vlgmr.msra.gmra.mxu3 %vm477_vm1, %v1680_v33  ;;  %2688 = vrcp.f32 %v1644_v44 }
 0x5a3   : > { %2404 = vmatmul.msk.f32.vlgmr.msra.gmra.mxu0 %vm477_vm1, %v1677_v41  ;;  %2690 = vrcp.f32 %v1641_v42 }
 0x5a7   : > { %v2687_v56 = vpop.eup %2686 }
 0x5a8   : > { %v1684_v63 = vmul.f32 %v2687_v56, %v2669_v47  ;;  %v2689_v20 = vpop.eup %2688  ;;  %v2567_v56 = vld [vmem:[%s3863_s4] ss:$0 sm:$0xff] }
 0x5a9   : > { %v2691_v46 = vpop.eup %2690  ;;  %v1682_v19 = vmul.f32 %v2689_v20, %v3722_v50 }
 0x5aa   : > { %2411 = vmatmul.msk.f32.vlgmr.msrb.gmra.mxu3 %vm477_vm1, %v1684_v63  ;;  %v1681_v25 = vmul.f32 %v2691_v46, %v3754_v35  ;;  %v1735_v35 = vpop.f32.mrf.mxu2 }
 0x5b8   : > { %v2558_v58 = vpop.permute.xlu1 %2557 }
 0x5b9   : > { %v2560_v22 = vunpack.i.h.bf16 %v2558_v58  ;;  %v2559_v4 = vunpack.i.l.bf16 %v2558_v58 }
 0x5bb   : > { %1993 = vmatpush.msrb.mxu0 %v2559_v4  ;;  %2019 = vmatpush.msrb.mxu1 %v2560_v22 }
 0x5bc   : > { %2408 = vmatmul.msk.f32.vlgmr.msrb.gmra.mxu0 %vm477_vm1, %v1681_v25  ;;  %2409 = vmatmul.msk.f32.vlgmr.msrb.gmra.mxu1 %vm477_vm1, %v1682_v19 }
 0x5bd   : > { %2196 = vmatpush.msra.mxu1 %v2167_v45 }
 0x5bf   : > { %2197 = vmatpush.msra.mxu1 %v2166_v8 }
 0x5c1   : > { %2198 = vmatpush.msra.mxu1 %v2165_v1 }
 0x5c3   : > { %2199 = vmatpush.msra.mxu1 %v2164_v11 }
 0x5d6   : > { %v1647_v18 = vpop.xlane.xlu0 %1646 }
 0x5d7   : > { %2692 = vrcp.f32 %v1647_v18 }
 0x5d8   : > { %2694 = vrcp.f32 %v1653_v5 }
 0x5dd   : > { %v2693_v50 = vpop.eup %2692 }
 0x5de   : > { %v2695_v38 = vpop.eup %2694  ;;  %v1683_v13 = vmul.f32 %v2693_v50, %v3763_v48 }
 0x5df   : > { %v1685_v60 = vmul.f32 %v2695_v38, %v3726_v55 }
 0x5e0   : > { %v1813_v21 = vpop.f32.mrf.mxu1 }
 0x5e1   : > { %2106 = vrot.lane.b32.xlu0 %v1813_v21, %s2933_s14 }
 0x5e9   : > { %v2563_v24 = vpop.permute.xlu0 %2562 }
 0x5ea   : > { %v2565_v0 = vunpack.i.h.bf16 %v2563_v24  ;;  %v2564_v9 = vunpack.i.l.bf16 %v2563_v24 }
 0x5eb   : > { %v1865_v49 = vpop.f32.mrf.mxu3 }
 0x5ec   : > { %2110 = vrot.lane.b32.xlu1 %v1865_v49, %s2933_s14  ;;  %2045 = vmatpush.msrb.mxu2 %v2564_v9 }
 0x5ed   : > { %2097 = vmatpush.msra.mxu0 %v2565_v0  ;;  %2410 = vmatmul.msk.f32.vlgmr.msrb.gmra.mxu2 %vm477_vm1, %v1683_v13 }
 0x5ee   : > { %2412 = vmatmul.msk.f32.vlgmr.msra.gmra.mxu0 %vm477_vm1, %v1685_v60  ;;  %v1839_v55 = vpop.f32.mrf.mxu2  ;;  %2424 = vmatpush.msra.mxu2 %v2167_v45 }
 0x5f0   : > { %v1917_v47 = vpop.f32.mrf.mxu1  ;;  %2425 = vmatpush.msra.mxu2 %v2166_v8 }
 0x5f2   : > { %2426 = vmatpush.msra.mxu2 %v2165_v1 }
 0x5f4   : > { %2427 = vmatpush.msra.mxu2 %v2164_v11 }
 0x61d   : > { %v1943_v61 = vpop.f32.mrf.mxu2 }
 0x620   : > { %v1891_v51 = vpop.f32.mrf.mxu0 }
 0x621   : > { %2112 = vrot.lane.b32.xlu0 %v1891_v51, %s2933_s14 }
 0x625   : > { %v1969_v59 = vpop.f32.mrf.mxu3 }
 0x626   : > { %2126 = vrot.lane.b32.xlu1 %v1969_v59, %s2934_s16 }
 0x62d   : > { %v2073_v28 = vpop.f32.mrf.mxu3 }
 0x62e   : > { %2122 = vrot.lane.b32.xlu1 %v1917_v47, %s2934_s16  ;;  %2142 = vrot.lane.b32.xlu2 %v2073_v28, %s2935_s15 }
 0x636   : > { %2108 = vrot.lane.b32.xlu2 %v1839_v55, %s2933_s14 }
 0x639   : > { %v1995_v39 = vpop.f32.mrf.mxu0  ;;  %v2021_v37 = vpop.f32.mrf.mxu1 }
 0x63a   : > { %2138 = vrot.lane.b32.xlu1 %v2021_v37, %s2935_s15  ;;  %2128 = vrot.lane.b32.xlu0 %v1995_v39, %s2934_s16 }
 0x642   : > { %2124 = vrot.lane.b32.xlu0 %v1943_v61, %s2934_s16 }
 0x653   : > { %v2107_v7 = vpop.permute.xlu0 %2106 }
 0x654   : > { %v2150_v31 = vsel %vm477_vm1, %v3789_v12, %v2107_v7 }
 0x65e   : > { %v2111_v15 = vpop.permute.xlu1 %2110 }
 0x65f   : > { %v2152_v48 = vsel %vm477_vm1, %v1761_v6, %v2111_v15 }
 0x66b   : > { %v2099_v40 = vpop.f32.mrf.mxu0 }
 0x66c   : > { %2144 = vrot.lane.b32.xlu1 %v2099_v40, %s2935_s15 }
 0x670   : > { %v2047_v62 = vpop.f32.mrf.mxu2 }
 0x674   : > { %2140 = vrot.lane.b32.xlu1 %v2047_v62, %s2935_s15 }
 0x688   : > { %v2143_v10 = vpop.permute.xlu2 %2142 }
 0x690   : > { %v2109_v27 = vpop.permute.xlu2 %2108 }
 0x691   : > { %v2151_v53 = vsel %vm477_vm1, %v1735_v35, %v2109_v27 }
 0x693   : > { %v2113_v29 = vpop.permute.xlu0 %2112 }
 0x694   : > { %v2153_v3 = vsel %vm477_vm1, %v1787_v57, %v2113_v29 }
 0x698   : > { %v2127_v17 = vpop.permute.xlu1 %2126 }
 0x699   : > { %v2157_v23 = vsel %vm2154_vm14, %v2152_v48, %v2127_v17 }
 0x69a   : > { %v2162_v52 = vsel %vm2159_vm15, %v2157_v23, %v2143_v10 }
 0x69b   : > { %2415 = vmatmul.msk.f32.vlgmr.msra.gmra.mxu2 %vm379_vm0, %v2162_v52 }
 0x6a0   : > { %v2123_v16 = vpop.permute.xlu1 %2122 }
 0x6a1   : > { %v2155_v34 = vsel %vm2154_vm14, %v2150_v31, %v2123_v16 }
 0x6ac   : > { %v2139_v30 = vpop.permute.xlu1 %2138  ;;  %v2129_v43 = vpop.permute.xlu0 %2128 }
 0x6ad   : > { %v2160_v32 = vsel %vm2159_vm15, %v2155_v34, %v2139_v30  ;;  %v2158_v2 = vsel %vm2154_vm14, %v2153_v3, %v2129_v43 }
 0x6ae   : > { %2413 = vmatmul.msk.f32.vlgmr.msra.gmra.mxu1 %vm379_vm0, %v2160_v32 }
 0x6b4   : > { %v2125_v26 = vpop.permute.xlu0 %2124 }
 0x6b5   : > { %v2156_v33 = vsel %vm2154_vm14, %v2151_v53, %v2125_v26 }
 0x6de   : > { %v2145_v14 = vpop.permute.xlu1 %2144 }
 0x6df   : > { %v2163_v36 = vsel %vm2159_vm15, %v2158_v2, %v2145_v14 }
 0x6e0   : > { %2416 = vmatmul.msk.f32.gmra.mxu2 %vm379_vm0, %v2163_v36 }
 0x6e6   : > { %v2141_v54 = vpop.permute.xlu1 %2140 }
 0x6e7   : > { %v2161_v41 = vsel %vm2159_vm15, %v2156_v33, %v2141_v54 }
 0x6e8   : > { %2414 = vmatmul.msk.f32.gmra.mxu1 %vm379_vm0, %v2161_v41 }
 0x71e   : > { %v2207_v63 = vpop.f32.mrf.mxu2 }
 0x71f   : > { %v2208_v44 = vadd.f32 %v2567_v56, %v2207_v63 }
 0x721   : > { %2215 = vst.msk [vmem:[%s364_s10 + $0x10] sm:$0xff] %vm379_vm0, %v2208_v44 }
 0x72b   : > { %v2201_v42 = vpop.f32.mrf.mxu1 }
 0x72c   : > { %v2202_v20 = vadd.f32 %v2567_v56, %v2201_v42 }
 0x72e   : > { %2213 = vst.msk [vmem:[%s364_s10] sm:$0xff] %vm379_vm0, %v2202_v20 }
 0x763   : > { %v2210_v46 = vpop.f32.mrf.mxu2 }
 0x764   : > { %v2211_v58 = vadd.f32 %v2567_v56, %v2210_v46 }
 0x765   : > { %v2204_v22 = vpop.f32.mrf.mxu1 }
 0x766   : > { %2216 = vst.msk [vmem:[%s364_s10 + $0x18] sm:$0xff] %vm379_vm0, %v2211_v58  ;;  %v2205_v4 = vadd.f32 %v2567_v56, %v2204_v22 }
 0x768   : > { %2214 = vst.msk [vmem:[%s364_s10 + $0x8] sm:$0xff] %vm379_vm0, %v2205_v4 }
 0x769   : > { %2873 = shalt.err (!%p2870_p10)
}
 0x76a   : > { %s2936_s11 = smov 128  }
 0x76b   : > { %2446 = dma.vmem_to_hbm [thread:$0]  (%p3073_p3), %s2231_s23, 512, %s2233_s22, %s2218_s1, %s2936_s11, %s2936_s11, %s2933_s14  }
 0x76c PF: > { %s2247_s10 = sand.u32 1, %s2908_s24   ;;  %p3887_p12 = scmp.ge.s32.totalorder %s2920_s27, 2 }
 0x76d   : > { %s2248_s12 = scalar_lea.sflag [#allocation4], %s2247_s10 }
 0x76e   : > { %p2466_p13 = pnand %p3887_p12, %p3012_p6 }
 0x770   : > { %p2467_p0 = pneg %p2466_p13 }
 0x772   : > { %2903 = dma.done.wait (%p2467_p0), %s2248_s12, 512  }
 0x773   : > { %2905 = vsyncadd (%p2467_p0), %s2248_s12, 4294966784  ;;  %p22_p5 = scmp.ge.s32.totalorder %s3063_s21, 4   ;;  %s3888_s24 = smov %s2912_s25 }
 0x774   : > { %s3889_s25 = smov %s2916_s26  ;;  %s3890_s26 = smov %s3079_s9 }
 0x775   : > { %s3891_s27 = smov %s3063_s21  ;;  %24 = sbr.rel (!%p22_p5) target bundleno = 9 (0x9), region = 109 }
 0x77a   :  { %2254 = vsyncpa [#allocation3], 1 }
 0x77b   :  { %2256 = vsyncpa [#allocation3 + $0x1], 1 }
 0x77c   :  { %2257 = vsyncpa [#allocation6], 1 }
 0x77d   :  { %2258 = vsyncpa [#allocation9], 1 }
 0x77e   :  { %2259 = vsyncpa [#allocation4], 1 }
 0x77f   :  { %2261 = vsyncpa [#allocation4 + $0x1], 1 }

</bundles_post_ra>
